<compile_context>
chip_gen: v6e
topology: v6e:2x2x1
jax: 0.10.0
libtpu: 0.0.40
codegen_flags: <defaults>
</compile_context>

<pallas_src>
import jax
import jax.numpy as jnp
import numpy as np
from jax import lax
from jax.experimental import pallas as pl
from jax.experimental.pallas import tpu as pltpu

EPS = 1e-6  # GroupNorm eps used by Normalize(in_channels)


def _make_kernel(C, N_true, Np, TK):
    num_kt = Np // TK

    def kernel(x_ref, cvec_ref, gmat_ref, wqkv_ref, wp_ref, o_ref, kt_ref, v_ref):
        x = x_ref[0]                                       # (C, Np) f32

        # ---- GroupNorm: per-channel lane reductions + one tiny group matmul ----
        s1 = jnp.sum(x, axis=1, keepdims=True)             # (C, 1)
        s2 = jnp.sum(x * x, axis=1, keepdims=True)         # (C, 1)
        stats = jnp.dot(gmat_ref[...], jnp.concatenate([s1, s2], axis=1),
                        preferred_element_type=jnp.float32)  # (C, 2)
        mean = stats[:, 0:1]
        var = jnp.maximum(stats[:, 1:2] - mean * mean, 0.0)
        inv = lax.rsqrt(var + EPS)
        gamma = cvec_ref[:, 0:1]
        beta = cvec_ref[:, 1:2]
        sc = inv * gamma                                    # (C, 1)
        h = x * sc + (beta - mean * sc)                     # (C, Np)

        # ---- stacked q/k/v 1x1 conv: one (3C,C)@(C,Np) f32 MXU matmul ----
        qkv = jnp.dot(wqkv_ref[...], h,
                      preferred_element_type=jnp.float32)   # (3C, Np) f32
        q = qkv[0:C] + cvec_ref[:, 2:3]        # 1/sqrt(C) folded into wq & bq
        k = qkv[C:2 * C] + cvec_ref[:, 3:4]
        v = qkv[2 * C:3 * C] + cvec_ref[:, 4:5]

        kt_ref[...] = jnp.transpose(k)                      # (Np, C) f32
        v_ref[...] = v                                      # (C, Np) f32

        # ---- flash-style attention: online softmax over key tiles ----
        def kv_step(t, carry):
            m_prev, l_prev, acc_prev = carry
            koff = pl.multiple_of(t * TK, TK)
            kt_tile = kt_ref[pl.ds(koff, TK), :]            # (TK, C)
            s = jnp.dot(kt_tile, q,
                        preferred_element_type=jnp.float32)  # (TK, Np) f32
            if Np != N_true:                                # mask padded keys
                key_idx = koff + lax.broadcasted_iota(jnp.int32, (TK, Np), 0)
                s = jnp.where(key_idx < N_true, s, jnp.float32(-1e30))
            m_new = jnp.maximum(m_prev, jnp.max(s, axis=0, keepdims=True))  # (1, Np)
            alpha = jnp.exp(m_prev - m_new)                 # (1, Np)
            p = jnp.exp(s - m_new)                          # (TK, Np) unnormalized
            l_new = alpha * l_prev + jnp.sum(p, axis=0, keepdims=True)
            v_tile = v_ref[:, pl.ds(koff, TK)]              # (C, TK)
            pv = jnp.dot(v_tile, p,
                         preferred_element_type=jnp.float32)  # (C, Np)
            acc_new = alpha * acc_prev + pv
            return m_new, l_new, acc_new

        m0 = jnp.full((1, Np), -1e30, jnp.float32)
        l0 = jnp.zeros((1, Np), jnp.float32)
        acc0 = jnp.zeros((C, Np), jnp.float32)
        _, l, acc = lax.fori_loop(0, num_kt, kv_step, (m0, l0, acc0),
                                  unroll=num_kt <= 4)

        # deferred softmax normalization (one (1, Np)-broadcast divide)
        h_attn = acc / l                                    # (C, Np)

        # ---- output projection + residual ----
        proj = jnp.dot(wp_ref[...], h_attn,
                       preferred_element_type=jnp.float32) + cvec_ref[:, 5:6]
        o_ref[0] = x + proj

    return kernel


def spatial_self_attention(x_nchw, params, num_groups):
    """x_nchw: (B, C, H, W) float32. Returns (B, C, H, W) float32."""
    B, C, H, W = x_nchw.shape
    N = H * W
    Np = ((N + 127) // 128) * 128          # lane-dense spatial extent
    TK = 128
    for cand in (512, 256, 128):           # largest key tile dividing Np
        if Np % cand == 0:
            TK = cand
            break

    x = x_nchw.reshape(B, C, N).astype(jnp.float32)
    if Np != N:
        x = jnp.pad(x, ((0, 0), (0, 0), (0, Np - N)))

    # group-averaging matrix: 1/(gsize*N) for same-group channel pairs
    gsize = C // num_groups
    gid = jnp.arange(C) // gsize
    gmat = (gid[:, None] == gid[None, :]).astype(jnp.float32) / float(gsize * N)

    # fold 1/sqrt(C) into wq/bq; stack q/k/v weights
    scale = float(C) ** -0.5
    wqkv = jnp.concatenate(
        [params["wq"].astype(jnp.float32) * scale,
         params["wk"].astype(jnp.float32),
         params["wv"].astype(jnp.float32)], axis=0)                        # (3C, C)
    wp = params["wp"].astype(jnp.float32)                                  # (C, C)
    cvec = jnp.stack(
        [params["gamma"], params["beta"], params["bq"] * scale,
         params["bk"], params["bv"], params["bp"]], axis=1).astype(jnp.float32)  # (C, 6)

    # explicit VMEM budget: double-buffered IO/weights + scratch + live temps
    f32b = 4
    est = (4 * C * Np * f32b                                     # x + out (2 bufs each)
           + 2 * (C * 6 * f32b + C * C * f32b
                  + 3 * C * C * f32b + C * C * f32b)             # params (2 bufs)
           + 2 * C * Np * f32b                                   # kT / v scratch
           + 12 * C * Np * f32b + 2 * TK * Np * f32b)            # live intermediates
    vmem_limit = int(min(100 * 2 ** 20, max(16 * 2 ** 20, int(est * 1.3))))

    kernel = _make_kernel(C, N, Np, TK)
    batch_spec = pl.BlockSpec((1, C, Np), lambda b: (b, 0, 0))
    const = lambda shape: pl.BlockSpec(shape, lambda b: (0,) * len(shape))

    out = pl.pallas_call(
        kernel,
        out_shape=jax.ShapeDtypeStruct((B, C, Np), jnp.float32),
        grid_spec=pltpu.PrefetchScalarGridSpec(
            num_scalar_prefetch=0,
            grid=(B,),
            in_specs=[
                batch_spec,          # x
                const((C, 6)),       # packed gamma/beta/bq/bk/bv/bp
                const((C, C)),       # group-averaging matrix
                const((3 * C, C)),   # stacked q/k/v weights
                const((C, C)),       # proj weight
            ],
            out_specs=batch_spec,
            scratch_shapes=[
                pltpu.VMEM((Np, C), jnp.float32),   # k^T
                pltpu.VMEM((C, Np), jnp.float32),   # v
            ],
        ),
        compiler_params=pltpu.CompilerParams(
            dimension_semantics=("parallel",),
            vmem_limit_bytes=vmem_limit,
        ),
    )(x, cvec, gmat, wqkv, wp)

    return out[:, :, :N].reshape(B, C, H, W)


def reference_forward(x, params, num_groups):
    """Pure-JAX (f32) replica of the PyTorch forward for verification."""
    B, C, H, W = x.shape
    N = H * W
    g = num_groups
    xr = x.reshape(B, g, C // g, N)
    mean = xr.mean(axis=(2, 3), keepdims=True)
    var = xr.var(axis=(2, 3), keepdims=True)
    hn = (xr - mean) / jnp.sqrt(var + EPS)
    hn = hn.reshape(B, C, N) * params["gamma"][None, :, None] + params["beta"][None, :, None]

    def conv1x1(w, b, t):
        return jnp.einsum("oc,bcn->bon", w, t) + b[None, :, None]

    q = conv1x1(params["wq"], params["bq"], hn)       # (B, C, N)
    k = conv1x1(params["wk"], params["bk"], hn)
    v = conv1x1(params["wv"], params["bv"], hn)

    qT = jnp.transpose(q, (0, 2, 1))                  # (B, N, C)
    w_ = jnp.einsum("bij,bjk->bik", qT, k) * (int(C) ** (-0.5))   # (B, N, N)
    w_ = jax.nn.softmax(w_, axis=2)
    wT = jnp.transpose(w_, (0, 2, 1))                 # (B, N, N)
    h_ = jnp.einsum("bij,bjk->bik", v, wT)            # (B, C, N)
    proj = conv1x1(params["wp"], params["bp"], h_).reshape(B, C, H, W)
    return x + proj


if __name__ == "__main__":
    B, C, H, W = 2, 64, 16, 16     # N = H*W = 256 (lane-dense)
    NUM_GROUPS = 32                # Normalize() = GroupNorm(32, C)

    key = jax.random.PRNGKey(0)
    ks = jax.random.split(key, 11)
    x = jax.random.normal(ks[0], (B, C, H, W), dtype=jnp.float32)

    scale = 0.1
    params = {
        "gamma": 1.0 + scale * jax.random.normal(ks[1], (C,), dtype=jnp.float32),
        "beta": scale * jax.random.normal(ks[2], (C,), dtype=jnp.float32),
        "wq": scale * jax.random.normal(ks[3], (C, C), dtype=jnp.float32),
        "bq": scale * jax.random.normal(ks[4], (C,), dtype=jnp.float32),
        "wk": scale * jax.random.normal(ks[5], (C, C), dtype=jnp.float32),
        "bk": scale * jax.random.normal(ks[6], (C,), dtype=jnp.float32),
        "wv": scale * jax.random.normal(ks[7], (C, C), dtype=jnp.float32),
        "bv": scale * jax.random.normal(ks[8], (C,), dtype=jnp.float32),
        "wp": scale * jax.random.normal(ks[9], (C, C), dtype=jnp.float32),
        "bp": scale * jax.random.normal(ks[10], (C,), dtype=jnp.float32),
    }

    out = spatial_self_attention(x, params, NUM_GROUPS)
    out = jax.block_until_ready(out)

    ref = jax.block_until_ready(reference_forward(x, params, NUM_GROUPS))
    np.testing.assert_allclose(np.asarray(out), np.asarray(ref), rtol=2e-3, atol=2e-3)

    print("KERNEL_OK")
</pallas_src>

<mosaic_0001>
module attributes {stable_mosaic.version = 11 : i64} {
  func.func @kernel(%arg0: i32, %arg1: memref<1x64x256xf32, #tpu.memory_space<vmem>>, %arg2: memref<64x6xf32, #tpu.memory_space<vmem>>, %arg3: memref<64x64xf32, #tpu.memory_space<vmem>>, %arg4: memref<192x64xf32, #tpu.memory_space<vmem>>, %arg5: memref<64x64xf32, #tpu.memory_space<vmem>>, %arg6: memref<1x64x256xf32, #tpu.memory_space<vmem>>, %arg7: memref<256x64xf32, #tpu.memory_space<vmem>>, %arg8: memref<64x256xf32, #tpu.memory_space<vmem>>) attributes {dimension_semantics = [#tpu.dimension_semantics<parallel>], iteration_bounds = array<i64: 2>, scalar_prefetch = 0 : i64, scratch_operands = 2 : i64, tpu.core_type = #tpu.core_type<tc>, window_params = [{transform_indices = @transform_0, window_bounds = array<i64: 1, 64, 256>}, {pipeline_mode = #tpu.pipeline_mode<synchronous>, transform_indices = @transform_1, window_bounds = array<i64: 64, 6>}, {pipeline_mode = #tpu.pipeline_mode<synchronous>, transform_indices = @transform_2, window_bounds = array<i64: 64, 64>}, {pipeline_mode = #tpu.pipeline_mode<synchronous>, transform_indices = @transform_3, window_bounds = array<i64: 192, 64>}, {pipeline_mode = #tpu.pipeline_mode<synchronous>, transform_indices = @transform_4, window_bounds = array<i64: 64, 64>}, {transform_indices = @transform_5, window_bounds = array<i64: 1, 64, 256>}]} {
    %c0 = arith.constant 0 : index
    %c0_0 = arith.constant 0 : index
    %c0_1 = arith.constant 0 : index
    %0 = vector.load %arg1[%c0, %c0_0, %c0_1] : memref<1x64x256xf32, #tpu.memory_space<vmem>>, vector<1x64x256xf32>
    %1 = vector.shape_cast %0 : vector<1x64x256xf32> to vector<64x256xf32>
    %cst = arith.constant dense<0.000000e+00> : vector<64xf32>
    %2 = vector.multi_reduction <add>, %1, %cst [1] : vector<64x256xf32> to vector<64xf32>
    %3 = vector.shape_cast %2 : vector<64xf32> to vector<64x1xf32>
    %4 = arith.mulf %1, %1 : vector<64x256xf32>
    %cst_2 = arith.constant dense<0.000000e+00> : vector<64xf32>
    %5 = vector.multi_reduction <add>, %4, %cst_2 [1] : vector<64x256xf32> to vector<64xf32>
    %6 = vector.shape_cast %5 : vector<64xf32> to vector<64x1xf32>
    %c0_3 = arith.constant 0 : index
    %c0_4 = arith.constant 0 : index
    %7 = vector.load %arg3[%c0_3, %c0_4] : memref<64x64xf32, #tpu.memory_space<vmem>>, vector<64x64xf32>
    %8 = tpu.concatenate %3, %6 in 1 : vector<64x1xf32>, vector<64x1xf32> -> vector<64x2xf32>
    %cst_5 = arith.constant dense<0.000000e+00> : vector<64x2xf32>
    %9 = tpu.matmul %7, %8, %cst_5 {dimension_numbers = #tpu.dot_dimension_numbers<[1], [0], [0], [1], [0, 0, 1, 1], [], []>} : vector<64x64xf32>, vector<64x2xf32>, vector<64x2xf32> -> vector<64x2xf32>
    %10 = vector.extract_strided_slice %9 {offsets = [0, 0], sizes = [64, 1], strides = [1, 1]} : vector<64x2xf32> to vector<64x1xf32>
    %11 = vector.extract_strided_slice %9 {offsets = [0, 1], sizes = [64, 1], strides = [1, 1]} : vector<64x2xf32> to vector<64x1xf32>
    %12 = arith.mulf %10, %10 : vector<64x1xf32>
    %13 = arith.subf %11, %12 : vector<64x1xf32>
    %cst_6 = arith.constant 0.000000e+00 : f32
    %14 = vector.broadcast %cst_6 : f32 to vector<64x1xf32>
    %15 = arith.maximumf %13, %14 : vector<64x1xf32>
    %cst_7 = arith.constant 9.99999997E-7 : f32
    %16 = vector.broadcast %cst_7 : f32 to vector<64x1xf32>
    %17 = arith.addf %15, %16 : vector<64x1xf32>
    %18 = math.rsqrt %17 : vector<64x1xf32>
    %c0_8 = arith.constant 0 : index
    %c0_9 = arith.constant 0 : index
    %19 = vector.load %arg2[%c0_8, %c0_9] : memref<64x6xf32, #tpu.memory_space<vmem>>, vector<64x1xf32>
    %c0_10 = arith.constant 0 : index
    %c1 = arith.constant 1 : index
    %20 = vector.load %arg2[%c0_10, %c1] : memref<64x6xf32, #tpu.memory_space<vmem>>, vector<64x1xf32>
    %21 = arith.mulf %18, %19 : vector<64x1xf32>
    %22 = vector.broadcast %21 : vector<64x1xf32> to vector<64x256xf32>
    %23 = arith.mulf %1, %22 : vector<64x256xf32>
    %24 = arith.mulf %10, %21 : vector<64x1xf32>
    %25 = arith.subf %20, %24 : vector<64x1xf32>
    %26 = vector.broadcast %25 : vector<64x1xf32> to vector<64x256xf32>
    %27 = arith.addf %23, %26 : vector<64x256xf32>
    %c0_11 = arith.constant 0 : index
    %c0_12 = arith.constant 0 : index
    %28 = vector.load %arg4[%c0_11, %c0_12] : memref<192x64xf32, #tpu.memory_space<vmem>>, vector<192x64xf32>
    %cst_13 = arith.constant dense<0.000000e+00> : vector<192x256xf32>
    %29 = tpu.matmul %28, %27, %cst_13 {dimension_numbers = #tpu.dot_dimension_numbers<[1], [0], [0], [1], [0, 0, 1, 1], [], []>} : vector<192x64xf32>, vector<64x256xf32>, vector<192x256xf32> -> vector<192x256xf32>
    %30 = vector.extract_strided_slice %29 {offsets = [0, 0], sizes = [64, 256], strides = [1, 1]} : vector<192x256xf32> to vector<64x256xf32>
    %c0_14 = arith.constant 0 : index
    %c2 = arith.constant 2 : index
    %31 = vector.load %arg2[%c0_14, %c2] : memref<64x6xf32, #tpu.memory_space<vmem>>, vector<64x1xf32>
    %32 = vector.broadcast %31 : vector<64x1xf32> to vector<64x256xf32>
    %33 = arith.addf %30, %32 : vector<64x256xf32>
    %34 = vector.extract_strided_slice %29 {offsets = [64, 0], sizes = [64, 256], strides = [1, 1]} : vector<192x256xf32> to vector<64x256xf32>
    %c0_15 = arith.constant 0 : index
    %c3 = arith.constant 3 : index
    %35 = vector.load %arg2[%c0_15, %c3] : memref<64x6xf32, #tpu.memory_space<vmem>>, vector<64x1xf32>
    %36 = vector.broadcast %35 : vector<64x1xf32> to vector<64x256xf32>
    %37 = arith.addf %34, %36 : vector<64x256xf32>
    %38 = vector.extract_strided_slice %29 {offsets = [128, 0], sizes = [64, 256], strides = [1, 1]} : vector<192x256xf32> to vector<64x256xf32>
    %c0_16 = arith.constant 0 : index
    %c4 = arith.constant 4 : index
    %39 = vector.load %arg2[%c0_16, %c4] : memref<64x6xf32, #tpu.memory_space<vmem>>, vector<64x1xf32>
    %40 = vector.broadcast %39 : vector<64x1xf32> to vector<64x256xf32>
    %41 = arith.addf %38, %40 : vector<64x256xf32>
    %42 = tpu.transpose %37, [1, 0] : vector<64x256xf32> -> vector<256x64xf32>
    %c0_17 = arith.constant 0 : index
    %c0_18 = arith.constant 0 : index
    %43 = vector.load %arg7[%c0_17, %c0_18] : memref<256x64xf32, #tpu.memory_space<vmem>>, vector<256x64xf32>
    tpu.vector_store %arg7[%c0_17, %c0_18], %42 {strides = array<i32>} : memref<256x64xf32, #tpu.memory_space<vmem>>, vector<256x64xf32>,
    %c0_19 = arith.constant 0 : index
    %c0_20 = arith.constant 0 : index
    %44 = vector.load %arg8[%c0_19, %c0_20] : memref<64x256xf32, #tpu.memory_space<vmem>>, vector<64x256xf32>
    tpu.vector_store %arg8[%c0_19, %c0_20], %41 {strides = array<i32>} : memref<64x256xf32, #tpu.memory_space<vmem>>, vector<64x256xf32>,
    %cst_21 = arith.constant -1.000000e+30 : f32
    %45 = vector.broadcast %cst_21 : f32 to vector<1x256xf32>
    %cst_22 = arith.constant 0.000000e+00 : f32
    %46 = vector.broadcast %cst_22 : f32 to vector<1x256xf32>
    %cst_23 = arith.constant 0.000000e+00 : f32
    %47 = vector.broadcast %cst_23 : f32 to vector<64x256xf32>
    %c0_i32 = arith.constant 0 : i32
    %c256_i32 = arith.constant 256 : i32
    %48 = arith.muli %c0_i32, %c256_i32 : i32
    %49 = tpu.assume_multiple %48, 256 : i32
    %50 = arith.index_cast %49 : i32 to index
    %c0_24 = arith.constant 0 : index
    %51 = vector.load %arg7[%50, %c0_24] : memref<256x64xf32, #tpu.memory_space<vmem>>, vector<256x64xf32>
    %cst_25 = arith.constant dense<0.000000e+00> : vector<256x256xf32>
    %52 = tpu.matmul %51, %33, %cst_25 {dimension_numbers = #tpu.dot_dimension_numbers<[1], [0], [0], [1], [0, 0, 1, 1], [], []>} : vector<256x64xf32>, vector<64x256xf32>, vector<256x256xf32> -> vector<256x256xf32>
    %cst_26 = arith.constant dense<0xFF800000> : vector<256xf32>
    %53 = vector.multi_reduction <maximumf>, %52, %cst_26 [0] : vector<256x256xf32> to vector<256xf32>
    %54 = vector.shape_cast %53 : vector<256xf32> to vector<1x256xf32>
    %55 = arith.maximumf %45, %54 : vector<1x256xf32>
    %56 = arith.subf %45, %55 : vector<1x256xf32>
    %57 = math.exp %56 : vector<1x256xf32>
    %58 = vector.broadcast %55 : vector<1x256xf32> to vector<256x256xf32>
    %59 = arith.subf %52, %58 : vector<256x256xf32>
    %60 = math.exp %59 : vector<256x256xf32>
    %61 = arith.mulf %57, %46 : vector<1x256xf32>
    %cst_27 = arith.constant dense<0.000000e+00> : vector<256xf32>
    %62 = vector.multi_reduction <add>, %60, %cst_27 [0] : vector<256x256xf32> to vector<256xf32>
    %63 = vector.shape_cast %62 : vector<256xf32> to vector<1x256xf32>
    %64 = arith.addf %61, %63 : vector<1x256xf32>
    %c0_28 = arith.constant 0 : index
    %65 = arith.index_cast %49 : i32 to index
    %66 = vector.load %arg8[%c0_28, %65] : memref<64x256xf32, #tpu.memory_space<vmem>>, vector<64x256xf32>
    %cst_29 = arith.constant dense<0.000000e+00> : vector<64x256xf32>
    %67 = tpu.matmul %66, %60, %cst_29 {dimension_numbers = #tpu.dot_dimension_numbers<[1], [0], [0], [1], [0, 0, 1, 1], [], []>} : vector<64x256xf32>, vector<256x256xf32>, vector<64x256xf32> -> vector<64x256xf32>
    %68 = vector.broadcast %57 : vector<1x256xf32> to vector<64x256xf32>
    %69 = arith.mulf %68, %47 : vector<64x256xf32>
    %70 = arith.addf %69, %67 : vector<64x256xf32>
    %c1_i32 = arith.constant 1 : i32
    %71 = vector.broadcast %64 : vector<1x256xf32> to vector<64x256xf32>
    %72 = arith.divf %70, %71 : vector<64x256xf32>
    %c0_30 = arith.constant 0 : index
    %c0_31 = arith.constant 0 : index
    %73 = vector.load %arg5[%c0_30, %c0_31] : memref<64x64xf32, #tpu.memory_space<vmem>>, vector<64x64xf32>
    %cst_32 = arith.constant dense<0.000000e+00> : vector<64x256xf32>
    %74 = tpu.matmul %73, %72, %cst_32 {dimension_numbers = #tpu.dot_dimension_numbers<[1], [0], [0], [1], [0, 0, 1, 1], [], []>} : vector<64x64xf32>, vector<64x256xf32>, vector<64x256xf32> -> vector<64x256xf32>
    %c0_33 = arith.constant 0 : index
    %c5 = arith.constant 5 : index
    %75 = vector.load %arg2[%c0_33, %c5] : memref<64x6xf32, #tpu.memory_space<vmem>>, vector<64x1xf32>
    %76 = vector.broadcast %75 : vector<64x1xf32> to vector<64x256xf32>
    %77 = arith.addf %74, %76 : vector<64x256xf32>
    %78 = arith.addf %1, %77 : vector<64x256xf32>
    %c0_34 = arith.constant 0 : index
    %c0_35 = arith.constant 0 : index
    %c0_36 = arith.constant 0 : index
    %79 = vector.load %arg6[%c0_34, %c0_35, %c0_36] : memref<1x64x256xf32, #tpu.memory_space<vmem>>, vector<1x64x256xf32>
    %80 = vector.shape_cast %79 : vector<1x64x256xf32> to vector<64x256xf32>
    %81 = vector.shape_cast %78 : vector<64x256xf32> to vector<1x64x256xf32>
    tpu.vector_store %arg6[%c0_34, %c0_35, %c0_36], %81 {strides = array<i32>} : memref<1x64x256xf32, #tpu.memory_space<vmem>>, vector<1x64x256xf32>,
    return
  }
  func.func @transform_0(%arg0: i32) -> (i32, i32, i32) {
    %c0_i32 = arith.constant 0 : i32
    %c0_i32_0 = arith.constant 0 : i32
    %c0_i32_1 = arith.constant 0 : i32
    return %arg0, %c0_i32, %c0_i32_0 : i32, i32, i32
  }
  func.func @transform_1(%arg0: i32) -> (i32, i32) {
    %c0_i32 = arith.constant 0 : i32
    %c0_i32_0 = arith.constant 0 : i32
    %c0_i32_1 = arith.constant 0 : i32
    return %c0_i32, %c0_i32_0 : i32, i32
  }
  func.func @transform_2(%arg0: i32) -> (i32, i32) {
    %c0_i32 = arith.constant 0 : i32
    %c0_i32_0 = arith.constant 0 : i32
    %c0_i32_1 = arith.constant 0 : i32
    return %c0_i32, %c0_i32_0 : i32, i32
  }
  func.func @transform_3(%arg0: i32) -> (i32, i32) {
    %c0_i32 = arith.constant 0 : i32
    %c0_i32_0 = arith.constant 0 : i32
    %c0_i32_1 = arith.constant 0 : i32
    return %c0_i32, %c0_i32_0 : i32, i32
  }
  func.func @transform_4(%arg0: i32) -> (i32, i32) {
    %c0_i32 = arith.constant 0 : i32
    %c0_i32_0 = arith.constant 0 : i32
    %c0_i32_1 = arith.constant 0 : i32
    return %c0_i32, %c0_i32_0 : i32, i32
  }
  func.func @transform_5(%arg0: i32) -> (i32, i32, i32) {
    %c0_i32 = arith.constant 0 : i32
    %c0_i32_0 = arith.constant 0 : i32
    %c0_i32_1 = arith.constant 0 : i32
    return %arg0, %c0_i32, %c0_i32_0 : i32, i32, i32
  }
}

</mosaic_0001>

<bundles_post_ra>
// kernel: tpu_custom_call.1
= control target key start
LH: loop header
LB: loop body
LE: loop exit
PB: predicated region body
PF: predicated region fallthrough
CT: control target
= control target key end

     0   :  { %10 = vsyncpa [#allocation5], 0  ;;  %s4468_s0 = inlined_call_operand.vmem [shape: f32[2,64,256], index: 0, kind: input, shape index: {}]   ;;  %s4469_s1 = inlined_call_operand.vmem [shape: f32[64,6], index: 1, kind: input, shape index: {}]   ;;  %s4470_s2 = inlined_call_operand.vmem [shape: f32[64,64], index: 2, kind: input, shape index: {}]   ;;  %s4471_s3 = inlined_call_operand.vmem [shape: f32[192,64], index: 3, kind: input, shape index: {}]   ;;  %s4472_s4 = inlined_call_operand.vmem [shape: f32[64,64], index: 4, kind: input, shape index: {}]   ;;  %s4473_s5 = inlined_call_operand.hbm [shape: f32[2,64,256], index: 5, kind: output, shape index: {}]  }
   0x1   :  { %12 = vsyncpa [#allocation5 + $0x1], 0  ;;  %s3048_s18 = smov 0   ;;  %s3050_s19 = smov 0  }
   0x2   :  { %s3052_s20 = smov 0   ;;  %s3054_s21 = smov 0  }
   0x3 LB: > { %s3069_s22 = sadd.s32 4294967295, %s3005_s21   ;;  %s2516_s23 = sadd.s32 4294967294, %s3005_s21   ;;  %s3005_s21 = sphi %s3054_s21, %s4565_s21   ;;  %s3001_s20 = sphi %s3052_s20, %s4564_s20   ;;  %s2997_s19 = sphi %s3050_s19, %s4563_s19   ;;  %s2993_s18 = sphi %s3048_s18, %s4562_s18  }
   0x4   : > { %s3073_s24 = sadd.s32 1, %s3005_s21   ;;  %s135_s25 = sadd.s32 1, %s3001_s20 }
   0x5   : > { %s132_s26 = ssub.s32 %s3005_s21, %s3073_s24  ;;  %p145_p0 = scmp.ne.s32.totalorder %s3001_s20, %s2997_s19 }
   0x6   : > { %p133_p1 = scmp.eq.s32.totalorder %s132_s26, 0  ;;  %p146_p2 = scmp.eq.s32.totalorder %s3069_s22, 1 }
   0x7   : > { %p151_p3 = scmp.ne.s32.totalorder %s2997_s19, %s2993_s18  ;;  %p152_p4 = scmp.eq.s32.totalorder %s2516_s23, 1 }
   0x8   : > { %s3084_s27 = scalar_select %p133_p1, %s3001_s20, %s135_s25  }
   0x9   : > { %p3086_p5 = por %p146_p2, %p145_p0  ;;  %p3090_p6 = por %p152_p4, %p151_p3 }
   0xa   : > { %p2519_p7 = scmp.ge.s32.totalorder %s3005_s21, 1  ;;  %p190_p8 = scmp.lt.s32.totalorder %s3005_s21, 3 }
   0xc   : > { %p191_p9 = pnand %p2519_p7, %p190_p8 }
   0xe   : > { %194 = sbr.rel (%p191_p9) target bundleno = 2231 (0x8b7), region = 40 }
  0x13   : > { %p218_p10 = scmp.lt.s32.totalorder %s3069_s22, 1  ;;  %v303_v48 = vld [vmem:[%s4470_s2] sm:$0xff]  ;;  %vm320_vm0 = vcmask 523264   ;;  %vm311_vm1 = vcmask 7168   ;;  %s3007_s11 = smov 1  }
  0x14   : > { %2634 = vmatprep.mubr.msk.f32.mxu0 %vm320_vm0, %v303_v48  ;;  %s3008_s14 = smov 127   ;;  %s215_s26 = sand.u32 1, %s2997_s19  }
  0x15   : > { %s219_s30 = scalar_select %p218_p10, %s3069_s22, 1 }
  0x16   : > { %s2601_s7 = sshll.u32 %s3069_s22, 11  ;;  %s4428_s22 = scalar_lea.sflag [#allocation5], %s215_s26 }
  0x17   : > { %s2600_s6 = sshll.u32 %s219_s30, 7  ;;  %s2520_s30 = sshll.u32 %s215_s26, 7 }
  0x18   : > { %s3101_s9 = scalar_lea.vmem %s4468_s0, %s2600_s6  ;;  %s4385_s6 = scalar_lea.vmem [#allocation4], %s2520_s30 }
  0x19   : > { %v3104_v0 = vld [vmem:[%s3101_s9 + $0x70] sm:$0xff]  ;;  %v3107_v1 = vld [vmem:[%s3101_s9 + $0x78] sm:$0xff]  ;;  %v3110_v2 = vld [vmem:[%s3101_s9 + $0x60] sm:$0xff]  ;;  %s2454_s8 = sshll.u32 %s4385_s6, 4  ;;  %s4419_s13 = scalar_lea.hbm %s4473_s5, %s2601_s7  ;;  %s4421_s8 = int_to_ptr.vmem [resolvable:$true] %s2454_s8 }
  0x1a   : > { %v260_v3 = vadd.f32 %v3107_v1, %v3104_v0  ;;  %v3115_v4 = vld [vmem:[%s3101_s9 + $0x68] sm:$0xff]  ;;  %v275_v5 = vmul.f32 %v3110_v2, %v3110_v2  ;;  %v3120_v6 = vld [vmem:[%s3101_s9 + $0x50] sm:$0xff]  ;;  %v3123_v7 = vld [vmem:[%s3101_s9 + $0x58] sm:$0xff]  ;;  %v277_v11 = vmul.f32 %v3104_v0, %v3104_v0  ;;  %v278_v12 = vmul.f32 %v3107_v1, %v3107_v1 }
  0x1b   : > { %v257_v8 = vadd.f32 %v3115_v4, %v3110_v2  ;;  %v276_v9 = vmul.f32 %v3115_v4, %v3115_v4  ;;  %v254_v10 = vadd.f32 %v3123_v7, %v3120_v6  ;;  %v273_v14 = vmul.f32 %v3120_v6, %v3120_v6  ;;  %v3140_v16 = vld [vmem:[%s3101_s9 + $0x40] sm:$0xff]  ;;  %v3143_v17 = vld [vmem:[%s3101_s9 + $0x48] sm:$0xff]  ;;  %v3150_v22 = vld [vmem:[%s3101_s9 + $0x30] sm:$0xff] }
  0x1c   : > { %261 = vadd.xlane.f32.xlu0 %v260_v3  ;;  %v274_v15 = vmul.f32 %v3123_v7, %v3123_v7  ;;  %v300_v18 = vadd.f32 %v278_v12, %v277_v11  ;;  %v271_v20 = vmul.f32 %v3140_v16, %v3140_v16  ;;  %v272_v21 = vmul.f32 %v3143_v17, %v3143_v17  ;;  %v3153_v23 = vld [vmem:[%s3101_s9 + $0x38] sm:$0xff]  ;;  %v3162_v28 = vld [vmem:[%s3101_s9 + $0x20] sm:$0xff]  ;;  %v3165_v29 = vld [vmem:[%s3101_s9 + $0x28] sm:$0xff] }
  0x1d   : > { %258 = vadd.xlane.f32.xlu1 %v257_v8  ;;  %v297_v13 = vadd.f32 %v276_v9, %v275_v5  ;;  %v251_v24 = vadd.f32 %v3143_v17, %v3140_v16  ;;  %v269_v26 = vmul.f32 %v3150_v22, %v3150_v22  ;;  %v270_v27 = vmul.f32 %v3153_v23, %v3153_v23  ;;  %v3174_v34 = vld [vmem:[%s3101_s9 + $0x10] sm:$0xff]  ;;  %v3177_v35 = vld [vmem:[%s3101_s9 + $0x18] sm:$0xff]  ;;  %v3186_v40 = vld [vmem:[%s3101_s9] sm:$0xff] }
  0x1e   : > { %v294_v19 = vadd.f32 %v274_v15, %v273_v14  ;;  %v291_v25 = vadd.f32 %v272_v21, %v271_v20  ;;  %v248_v30 = vadd.f32 %v3153_v23, %v3150_v22  ;;  %v267_v32 = vmul.f32 %v3162_v28, %v3162_v28  ;;  %v3189_v41 = vld [vmem:[%s3101_s9 + $0x8] sm:$0xff]  ;;  %v307_v20 = vld [vmem:[%s4470_s2 + $0x20] sm:$0xff] }
  0x1f   : > { %v288_v31 = vadd.f32 %v270_v27, %v269_v26  ;;  %v268_v33 = vmul.f32 %v3165_v29, %v3165_v29  ;;  %v245_v36 = vadd.f32 %v3165_v29, %v3162_v28  ;;  %v265_v38 = vmul.f32 %v3174_v34, %v3174_v34  ;;  %v304_v15 = vld [vmem:[%s4470_s2 + $0x8] sm:$0xff] }
  0x20   : > { %255 = vadd.xlane.f32.xlu0 %v254_v10  ;;  %v266_v39 = vmul.f32 %v3177_v35, %v3177_v35  ;;  %v242_v42 = vadd.f32 %v3177_v35, %v3174_v34  ;;  %v263_v44 = vmul.f32 %v3186_v40, %v3186_v40  ;;  %v264_v45 = vmul.f32 %v3189_v41, %v3189_v41  ;;  %v308_v21 = vld [vmem:[%s4470_s2 + $0x28] sm:$0xff] }
  0x21   : > { %298 = vadd.xlane.f32.xlu1 %v297_v13  ;;  %v285_v37 = vadd.f32 %v268_v33, %v267_v32  ;;  %v239_v46 = vadd.f32 %v3189_v41, %v3186_v40 }
  0x22   : > { %v282_v43 = vadd.f32 %v266_v39, %v265_v38  ;;  %v279_v47 = vadd.f32 %v264_v45, %v263_v44 }
  0x24   : > { %301 = vadd.xlane.f32.xlu0 %v300_v18  ;;  %v305_v18 = vld [vmem:[%s4470_s2 + $0x10] sm:$0xff] }
  0x25   : > { %295 = vadd.xlane.f32.xlu1 %v294_v19  ;;  %v306_v19 = vld [vmem:[%s4470_s2 + $0x18] sm:$0xff] }
  0x28   : > { %252 = vadd.xlane.f32.xlu0 %v251_v24  ;;  %v309_v24 = vld [vmem:[%s4470_s2 + $0x30] sm:$0xff] }
  0x29   : > { %292 = vadd.xlane.f32.xlu1 %v291_v25  ;;  %v310_v25 = vld [vmem:[%s4470_s2 + $0x38] sm:$0xff] }
  0x2c   : > { %249 = vadd.xlane.f32.xlu0 %v248_v30 }
  0x2d   : > { %289 = vadd.xlane.f32.xlu1 %v288_v31 }
  0x30   : > { %246 = vadd.xlane.f32.xlu0 %v245_v36 }
  0x31   : > { %286 = vadd.xlane.f32.xlu1 %v285_v37 }
  0x34   : > { %243 = vadd.xlane.f32.xlu0 %v242_v42 }
  0x35   : > { %283 = vadd.xlane.f32.xlu1 %v282_v43 }
  0x38   : > { %240 = vadd.xlane.f32.xlu0 %v239_v46 }
  0x39   : > { %280 = vadd.xlane.f32.xlu1 %v279_v47  ;;  %v3278_v47 = vld [vmem:[%s4469_s1 + $0x38] sm:$0xff] }
  0xa5   : > { %v262_v49 = vpop.xlane.xlu0 %261 }
  0xa6   : > { %v259_v50 = vpop.xlane.xlu1 %258 }
  0xa9   : > { %v256_v51 = vpop.xlane.xlu0 %255 }
  0xaa   : > { %v299_v52 = vpop.xlane.xlu1 %298 }
  0xab   : > { %v318_v56 = vsel %vm311_vm1, %v259_v50, %v299_v52  ;;  %v3294_v50 = vld [vmem:[%s4469_s1 + $0x30] sm:$0xff]  ;;  %v3308_v52 = vld [vmem:[%s4469_s1 + $0x20] sm:$0xff] }
  0xad   : > { %v302_v53 = vpop.xlane.xlu0 %301 }
  0xae   : > { %v296_v54 = vpop.xlane.xlu1 %295  ;;  %v319_v55 = vsel %vm311_vm1, %v262_v49, %v302_v53  ;;  %v3288_v49 = vld [vmem:[%s4469_s1 + $0x28] sm:$0xff] }
  0xaf   : > { %2618 = vmatprep.subr.mxu0 %v319_v55  ;;  %v317_v59 = vsel %vm311_vm1, %v256_v51, %v296_v54  ;;  %v3301_v51 = vld [vmem:[%s4469_s1 + $0x18] sm:$0xff]  ;;  %v3315_v53 = vld [vmem:[%s4469_s1 + $0x8] sm:$0xff]  ;;  %v3322_v54 = vld [vmem:[%s4469_s1 + $0x10] sm:$0xff] }
  0xb0   : > { %2619 = vmatpush3.msra.mxu0 %v319_v55  ;;  %v3331_v55 = vld [vmem:[%s4469_s1] sm:$0xff] }
  0xb1   : > { %2620 = vmatprep.subr.mxu0 %v318_v56  ;;  %v253_v57 = vpop.xlane.xlu0 %252 }
  0xb2   : > { %v293_v58 = vpop.xlane.xlu1 %292  ;;  %2621 = vmatpush3.msra.mxu0 %v318_v56 }
  0xb3   : > { %2622 = vmatprep.subr.mxu0 %v317_v59  ;;  %v316_v60 = vsel %vm311_vm1, %v253_v57, %v293_v58 }
  0xb4   : > { %2623 = vmatpush3.msra.mxu0 %v317_v59 }
  0xb5   : > { %2624 = vmatprep.subr.mxu0 %v316_v60  ;;  %v250_v61 = vpop.xlane.xlu0 %249 }
  0xb6   : > { %v290_v62 = vpop.xlane.xlu1 %289  ;;  %2625 = vmatpush3.msra.mxu0 %v316_v60 }
  0xb7   : > { %v315_v63 = vsel %vm311_vm1, %v250_v61, %v290_v62 }
  0xb8   : > { %2626 = vmatprep.subr.mxu0 %v315_v63 }
  0xb9   : > { %2627 = vmatpush3.msra.mxu0 %v315_v63  ;;  %v247_v3 = vpop.xlane.xlu0 %246 }
  0xba   : > { %v287_v5 = vpop.xlane.xlu1 %286 }
  0xbb   : > { %v314_v8 = vsel %vm311_vm1, %v247_v3, %v287_v5 }
  0xbc   : > { %2628 = vmatprep.subr.mxu0 %v314_v8 }
  0xbd   : > { %2629 = vmatpush3.msra.mxu0 %v314_v8  ;;  %v244_v9 = vpop.xlane.xlu0 %243 }
  0xbe   : > { %v284_v10 = vpop.xlane.xlu1 %283 }
  0xbf   : > { %v313_v11 = vsel %vm311_vm1, %v244_v9, %v284_v10 }
  0xc0   : > { %2630 = vmatprep.subr.mxu0 %v313_v11 }
  0xc1   : > { %2631 = vmatpush3.msra.mxu0 %v313_v11  ;;  %v241_v12 = vpop.xlane.xlu0 %240 }
  0xc2   : > { %v281_v13 = vpop.xlane.xlu1 %280 }
  0xc3   : > { %v312_v14 = vsel %vm311_vm1, %v241_v12, %v281_v13 }
  0xc4   : > { %2632 = vmatprep.subr.mxu0 %v312_v14 }
  0xc5   : > { %2633 = vmatpush3.msra.mxu0 %v312_v14 }
  0xc6   : > { %2635 = vmatmul.mubr.msk.f32.vlgmr.msra.gmra.mxu0 %vm320_vm0, %v304_v15 }
  0xc7   : > { %2637 = vmatprep.mubr.msk.f32.mxu0 %vm320_vm0, %v305_v18 }
  0xca   : > { %2638 = vmatmul.mubr.msk.f32.gmra.mxu0 %vm320_vm0, %v306_v19 }
  0xcb   : > { %2640 = vmatprep.mubr.msk.f32.mxu0 %vm320_vm0, %v307_v20 }
  0xce   : > { %2641 = vmatmul.mubr.msk.f32.gmra.mxu0 %vm320_vm0, %v308_v21 }
  0xcf   : > { %2643 = vmatprep.mubr.msk.f32.mxu0 %vm320_vm0, %v309_v24 }
  0xd2   : > { %2644 = vmatmul.mubr.msk.f32.gmra.mxu0 %vm320_vm0, %v310_v25 }
 0x186   : > { %v3239_v26 = vpop.f32.mrf.mxu0 }
 0x187   : > { %v451_v45 = vmul.f32 %v3239_v26, %v3239_v26 }
 0x188   : > { %v3241_v27 = vpop.f32.mrf.mxu0 }
 0x189   : > { %v450_v48 = vmul.f32 %v3241_v27, %v3241_v27 }
 0x18a   : > { %v3243_v30 = vpop.f32.mrf.mxu0 }
 0x18b   : > { %v453_v43 = vmul.f32 %v3243_v30, %v3243_v30 }
 0x18c   : > { %v3245_v31 = vpop.f32.mrf.mxu0 }
 0x18d   : > { %v452_v46 = vmul.f32 %v3245_v31, %v3245_v31 }
 0x18e   : > { %v3247_v32 = vpop.f32.mrf.mxu0 }
 0x18f   : > { %v455_v33 = vmul.f32 %v3247_v32, %v3247_v32 }
 0x190   : > { %v3251_v36 = vpop.f32.mrf.mxu0 }
 0x191   : > { %476 = vrot.lane.b32.xlu1 %v455_v33, %s3007_s11  ;;  %v454_v44 = vmul.f32 %v3251_v36, %v3251_v36 }
 0x192   : > { %v3254_v37 = vpop.f32.mrf.mxu0 }
 0x193   : > { %v457_v38 = vmul.f32 %v3254_v37, %v3254_v37 }
 0x194   : > { %v3258_v39 = vpop.f32.mrf.mxu0 }
 0x195   : > { %v456_v42 = vmul.f32 %v3258_v39, %v3258_v39  ;;  %480 = vrot.lane.b32.xlu0 %v457_v38, %s3007_s11 }
 0x197   : > { %478 = vrot.lane.b32.xlu1 %v456_v42, %s3007_s11 }
 0x199   : > { %472 = vrot.lane.b32.xlu0 %v453_v43, %s3007_s11 }
 0x19b   : > { %474 = vrot.lane.b32.xlu1 %v454_v44, %s3007_s11 }
 0x19d   : > { %468 = vrot.lane.b32.xlu0 %v451_v45, %s3007_s11 }
 0x19f   : > { %470 = vrot.lane.b32.xlu1 %v452_v46, %s3007_s11 }
 0x1a1   : > { %552 = vrot.lane.b32.xlu0 %v3278_v47, %s3007_s11 }
 0x1a3   : > { %466 = vrot.lane.b32.xlu1 %v450_v48, %s3007_s11 }
 0x1a5   : > { %548 = vrot.lane.b32.xlu0 %v3288_v49, %s3007_s11 }
 0x1a7   : > { %550 = vrot.lane.b32.xlu1 %v3294_v50, %s3007_s11 }
 0x1a9   : > { %544 = vrot.lane.b32.xlu0 %v3301_v51, %s3007_s11 }
 0x1ab   : > { %546 = vrot.lane.b32.xlu1 %v3308_v52, %s3007_s11 }
 0x1ad   : > { %540 = vrot.lane.b32.xlu0 %v3315_v53, %s3007_s11 }
 0x1af   : > { %542 = vrot.lane.b32.xlu1 %v3322_v54, %s3007_s11 }
 0x1b3   : > { %538 = vrot.lane.b32.xlu1 %v3331_v55, %s3007_s11 }
 0x203   : > { %v477_v56 = vpop.permute.xlu1 %476 }
 0x204   : > { %v495_v57 = vsub.f32 %v3247_v32, %v477_v56 }
 0x206   : > { %v503_v58 = vmax.f32 %v495_v57, 0.0 }
 0x207   : > { %v481_v59 = vpop.permute.xlu0 %480 }
 0x208   : > { %v497_v60 = vsub.f32 %v3254_v37, %v481_v59  ;;  %v511_v3 = vadd.f32 1e-06, %v503_v58 }
 0x209   : > { %v479_v61 = vpop.permute.xlu1 %478 }
 0x20a   : > { %v505_v62 = vmax.f32 %v497_v60, 0.0  ;;  %v496_v63 = vsub.f32 %v3258_v39, %v479_v61 }
 0x20b   : > { %v473_v5 = vpop.permute.xlu0 %472 }
 0x20c   : > { %v513_v8 = vadd.f32 1e-06, %v505_v62  ;;  %v504_v9 = vmax.f32 %v496_v63, 0.0  ;;  %v493_v10 = vsub.f32 %v3243_v30, %v473_v5 }
 0x20d   : > { %v475_v11 = vpop.permute.xlu1 %474 }
 0x20e   : > { %2769 = vrsqrt.f32 %v513_v8  ;;  %v512_v12 = vadd.f32 1e-06, %v504_v9  ;;  %v501_v13 = vmax.f32 %v493_v10, 0.0  ;;  %v494_v14 = vsub.f32 %v3251_v36, %v475_v11 }
 0x20f   : > { %2771 = vrsqrt.f32 %v511_v3  ;;  %v469_v15 = vpop.permute.xlu0 %468 }
 0x210   : > { %2773 = vrsqrt.f32 %v512_v12  ;;  %v509_v18 = vadd.f32 1e-06, %v501_v13  ;;  %v502_v19 = vmax.f32 %v494_v14, 0.0  ;;  %v491_v20 = vsub.f32 %v3239_v26, %v469_v15 }
 0x211   : > { %v471_v21 = vpop.permute.xlu1 %470  ;;  %v3009_v13 = vmov 1  }
 0x212   : > { %v510_v24 = vadd.f32 1e-06, %v502_v19  ;;  %v499_v25 = vmax.f32 %v491_v20, 0.0  ;;  %v492_v33 = vsub.f32 %v3245_v31, %v471_v21  ;;  %2775 = vrsqrt.f32 %v509_v18  ;;  %2760 = vset.pattern.permute.xlu1 %v3009_v13  ;;  %2759 = vset.pattern.permute.xlu0 %v3009_v13 }
 0x213   : > { %v553_v43 = vpop.permute.xlu0 %552 }
 0x214   : > { %2777 = vrsqrt.f32 %v510_v24  ;;  %v507_v38 = vadd.f32 1e-06, %v499_v25  ;;  %v500_v42 = vmax.f32 %v492_v33, 0.0 }
 0x215   : > { %v467_v44 = vpop.permute.xlu1 %466 }
 0x216   : > { %v508_v45 = vadd.f32 1e-06, %v500_v42  ;;  %v490_v46 = vsub.f32 %v3241_v27, %v467_v44  ;;  %2779 = vrsqrt.f32 %v507_v38 }
 0x217   : > { %v549_v59 = vpop.permute.xlu0 %548 }
 0x218   : > { %2781 = vrsqrt.f32 %v508_v45  ;;  %v498_v48 = vmax.f32 %v490_v46, 0.0 }
 0x219   : > { %v551_v56 = vpop.permute.xlu1 %550 }
 0x21a   : > { %v506_v57 = vadd.f32 1e-06, %v498_v48 }
 0x21b   : > { %v2770_v58 = vpop.eup %2769  ;;  %v545_v5 = vpop.permute.xlu0 %544 }
 0x21c   : > { %v2772_v60 = vpop.eup %2771  ;;  %v569_v61 = vmul.f32 %v2770_v58, %v553_v43  ;;  %2783 = vrsqrt.f32 %v506_v57 }
 0x21d   : > { %v2774_v62 = vpop.eup %2773  ;;  %v547_v63 = vpop.permute.xlu1 %546  ;;  %v567_v9 = vmul.f32 %v2772_v60, %v549_v59 }
 0x21e   : > { %v568_v3 = vmul.f32 %v2774_v62, %v551_v56  ;;  %640 = vrot.lane.b32.xlu0 %v569_v61, %s3008_s14 }
 0x21f   : > { %v2776_v8 = vpop.eup %2775  ;;  %v541_v19 = vpop.permute.xlu0 %540 }
 0x220   : > { %638 = vrot.lane.b32.xlu1 %v568_v3, %s3008_s14  ;;  %v565_v15 = vmul.f32 %v2776_v8, %v545_v5 }
 0x221   : > { %v2778_v10 = vpop.eup %2777  ;;  %v543_v11 = vpop.permute.xlu1 %542 }
 0x222   : > { %v566_v12 = vmul.f32 %v2778_v10, %v547_v63  ;;  %636 = vrot.lane.b32.xlu0 %v567_v9, %s3008_s14 }
 0x223   : > { %v2780_v14 = vpop.eup %2779 }
 0x224   : > { %634 = vrot.lane.b32.xlu1 %v566_v12, %s3008_s14  ;;  %v563_v24 = vmul.f32 %v2780_v14, %v541_v19  ;;  %v3012_v19 = vmov 2  }
 0x225   : > { %v2782_v18 = vpop.eup %2781  ;;  %v539_v21 = vpop.permute.xlu1 %538 }
 0x226   : > { %v564_v20 = vmul.f32 %v2782_v18, %v543_v11  ;;  %632 = vrot.lane.b32.xlu0 %v565_v15, %s3008_s14  ;;  %v3011_v18 = vmov 3  }
 0x228   : > { %630 = vrot.lane.b32.xlu1 %v564_v20, %s3008_s14 }
 0x229   : > { %v2784_v25 = vpop.eup %2783 }
 0x22a   : > { %v562_v33 = vmul.f32 %v2784_v25, %v539_v21  ;;  %628 = vrot.lane.b32.xlu0 %v563_v24, %s3008_s14 }
 0x22c   : > { %626 = vrot.lane.b32.xlu1 %v562_v33, %s3008_s14  ;;  %s2945_s14 = scalar_lea.vmem %s4421_s8, 2048 }
 0x22d   : > { %p2946_p11 = scmp.ne.s32.totalorder %s4421_s8, %s2945_s14 }
 0x22f   : > { %p2947_p12 = pnand %p2946_p11, %p3086_p5 }
 0x231   : > { %p2948_p13 = pneg %p2947_p12 }
 0x290   : > { %v641_v38 = vpop.permute.xlu0 %640 }
 0x291   : > { %v657_v42 = vmul.f32 %v3254_v37, %v641_v38 }
 0x292   : > { %v639_v43 = vpop.permute.xlu1 %638 }
 0x293   : > { %v656_v44 = vmul.f32 %v639_v43, %v3258_v39  ;;  %680 = vrot.lane.b32.xlu0 %v657_v42, %s3007_s11 }
 0x294   : > { %v637_v45 = vpop.permute.xlu0 %636 }
 0x295   : > { %v655_v46 = vmul.f32 %v3247_v32, %v637_v45  ;;  %678 = vrot.lane.b32.xlu1 %v656_v44, %s3007_s11 }
 0x296   : > { %v635_v48 = vpop.permute.xlu1 %634 }
 0x297   : > { %v654_v56 = vmul.f32 %v635_v48, %v3251_v36  ;;  %676 = vrot.lane.b32.xlu0 %v655_v46, %s3007_s11 }
 0x298   : > { %v633_v57 = vpop.permute.xlu0 %632 }
 0x299   : > { %v653_v58 = vmul.f32 %v3243_v30, %v633_v57  ;;  %674 = vrot.lane.b32.xlu1 %v654_v56, %s3007_s11 }
 0x29a   : > { %v631_v37 = vpop.permute.xlu1 %630 }
 0x29b   : > { %v652_v39 = vmul.f32 %v631_v37, %v3245_v31  ;;  %672 = vrot.lane.b32.xlu0 %v653_v58, %s3007_s11 }
 0x29c   : > { %v629_v59 = vpop.permute.xlu0 %628 }
 0x29d   : > { %v651_v32 = vmul.f32 %v3239_v26, %v629_v59  ;;  %670 = vrot.lane.b32.xlu1 %v652_v39, %s3007_s11 }
 0x29e   : > { %v627_v60 = vpop.permute.xlu1 %626 }
 0x29f   : > { %v650_v36 = vmul.f32 %v627_v60, %v3241_v27  ;;  %668 = vrot.lane.b32.xlu0 %v651_v32, %s3007_s11 }
 0x2a1   : > { %666 = vrot.lane.b32.xlu1 %v650_v36, %s3007_s11  ;;  %s3015_s11 = smov [#allocation4]  }
 0x2a2   : > { %s2949_s15 = sshll.u32 %s3015_s11, 4  ;;  %s2950_s15 = int_to_ptr.vmem [resolvable:$false] %s2949_s15 }
 0x2a3   : > { %607 = vperm.xlu0 %2759, %v569_v61   ;;  %s2951_s16 = scalar_lea.vmem %s2950_s15, 4096  ;;  %p2952_p0 = scmp.lt.s32.totalorder %s4421_s8, %s2950_s15 }
 0x2a4   : > { %p2953_p1 = scmp.lt.s32.totalorder %s2951_s16, %s2945_s14 }
 0x2a5   : > { %602 = vperm.xlu1 %2760, %v568_v3  }
 0x2a6   : > { %p2954_p2 = por %p2953_p1, %p2952_p0 }
 0x2a7   : > { %597 = vperm.xlu0 %2759, %v567_v9  }
 0x2a8   : > { %p2955_p3 = pnand %p2954_p2, %p2948_p13 }
 0x2ab   : > { %592 = vperm.xlu0 %2759, %v566_v12  }
 0x2af   : > { %587 = vperm.xlu0 %2759, %v565_v15   ;;  %v4474_v15 = vmov 0.0  }
 0x2b0   : > { %914 = vmatprep.mubr.f32.mxu1 %v4474_v15  ;;  %1507 = vmatprep.mubr.f32.mxu0 %v4474_v15 }
 0x2b3   : > { %582 = vperm.xlu0 %2759, %v564_v20  }
 0x2b7   : > { %577 = vperm.xlu0 %2759, %v563_v24  }
 0x2bb   : > { %572 = vperm.xlu0 %2759, %v562_v33  }
 0x305   : > { %v681_v30 = vpop.permute.xlu0 %680 }
 0x306   : > { %v697_v61 = vsub.f32 %v3278_v47, %v681_v30 }
 0x307   : > { %v679_v31 = vpop.permute.xlu1 %678 }
 0x308   : > { %v696_v9 = vsub.f32 %v3294_v50, %v679_v31 }
 0x309   : > { %v677_v26 = vpop.permute.xlu0 %676 }
 0x30a   : > { %v695_v62 = vsub.f32 %v3288_v49, %v677_v26 }
 0x30b   : > { %v675_v63 = vpop.permute.xlu1 %674 }
 0x30c   : > { %725 = vperm.xlu1 %2760, %v695_v62   ;;  %v694_v27 = vsub.f32 %v3308_v52, %v675_v63 }
 0x30d   : > { %v673_v10 = vpop.permute.xlu0 %672 }
 0x30e   : > { %v693_v11 = vsub.f32 %v3301_v51, %v673_v10  ;;  %v762_v10 = vld [vmem:[%s4471_s3 + $0x40] sm:$0xff] }
 0x30f   : > { %v671_v5 = vpop.permute.xlu1 %670 }
 0x310   : > { %720 = vperm.xlu1 %2760, %v694_v27   ;;  %v692_v12 = vsub.f32 %v3322_v54, %v671_v5 }
 0x311   : > { %v669_v13 = vpop.permute.xlu0 %668 }
 0x312   : > { %v691_v14 = vsub.f32 %v3315_v53, %v669_v13  ;;  %v765_v13 = vld [vmem:[%s4471_s3 + $0x58] sm:$0xff] }
 0x313   : > { %v667_v3 = vpop.permute.xlu1 %666 }
 0x314   : > { %v690_v8 = vsub.f32 %v3331_v55, %v667_v3  ;;  %735 = vperm.xlu1 %2760, %v697_v61   ;;  %v758_v61 = vld [vmem:[%s4471_s3 + $0x20] sm:$0xff]  ;;  %v759_v3 = vld [vmem:[%s4471_s3 + $0x28] sm:$0xff] }
 0x316   : > { %700 = vperm.xlu0 %2759, %v690_v8   ;;  %v760_v8 = vld [vmem:[%s4471_s3 + $0x30] sm:$0xff] }
 0x318   : > { %730 = vperm.xlu1 %2760, %v696_v9   ;;  %v761_v9 = vld [vmem:[%s4471_s3 + $0x38] sm:$0xff] }
 0x31a   : > { %2762 = vset.pattern.permute.xlu0 %v3011_v18 }
 0x31b   : > { %1112 = vperm.xlu0 %2762, %v3315_v53  }
 0x31c   : > { %715 = vperm.xlu1 %2760, %v693_v11   ;;  %v763_v11 = vld [vmem:[%s4471_s3 + $0x48] sm:$0xff] }
 0x31e   : > { %v608_v20 = vpop.permute.xlu0 %607 }
 0x31f   : > { %1124 = vperm.xlu0 %2762, %v3308_v52  }
 0x320   : > { %710 = vperm.xlu1 %2760, %v692_v12   ;;  %v603_v24 = vpop.permute.xlu1 %602  ;;  %v764_v12 = vld [vmem:[%s4471_s3 + $0x50] sm:$0xff] }
 0x322   : > { %v598_v21 = vpop.permute.xlu0 %597 }
 0x323   : > { %1132 = vperm.xlu0 %2762, %v3294_v50   ;;  %v621_v44 = vmul.f32 %v598_v21, %v3123_v7  ;;  %v620_v48 = vmul.f32 %v598_v21, %v3120_v6 }
 0x324   : > { %705 = vperm.xlu1 %2760, %v691_v14   ;;  %v766_v14 = vld [vmem:[%s4471_s3 + $0x60] sm:$0xff] }
 0x326   : > { %v593_v25 = vpop.permute.xlu0 %592 }
 0x327   : > { %2763 = vset.pattern.permute.xlu0 %v3012_v19  ;;  %v618_v57 = vmul.f32 %v593_v25, %v3140_v16 }
 0x328   : > { %2761 = vset.pattern.permute.xlu1 %v3011_v18  ;;  %1088 = vperm.xlu0 %2763, %v3278_v47   ;;  %v767_v18 = vld [vmem:[%s4471_s3 + $0x68] sm:$0xff] }
 0x329   : > { %1108 = vperm.xlu1 %2761, %v3331_v55  }
 0x32a   : > { %v588_v33 = vpop.permute.xlu0 %587 }
 0x32b   : > { %v616_v7 = vmul.f32 %v588_v33, %v3150_v22 }
 0x32c   : > { %1076 = vperm.xlu0 %2763, %v3308_v52   ;;  %v625_v52 = vmul.f32 %v608_v20, %v3107_v1  ;;  %v619_v1 = vmul.f32 %v593_v25, %v3143_v17 }
 0x32d   : > { %1116 = vperm.xlu1 %2761, %v3322_v54  }
 0x330   : > { %1068 = vperm.xlu0 %2763, %v3322_v54  }
 0x331   : > { %1120 = vperm.xlu1 %2761, %v3301_v51  }
 0x334   : > { %1060 = vperm.xlu0 %2763, %v3331_v55   ;;  %v623_v55 = vmul.f32 %v603_v24, %v3115_v4  ;;  %v617_v4 = vmul.f32 %v588_v33, %v3153_v23 }
 0x335   : > { %1128 = vperm.xlu1 %2761, %v3288_v49  }
 0x339   : > { %1136 = vperm.xlu1 %2761, %v3278_v47  }
 0x33d   : > { %2764 = vset.pattern.permute.xlu1 %v3012_v19  ;;  %v768_v19 = vld [vmem:[%s4471_s3 + $0x70] sm:$0xff] }
 0x33e   : > { %1084 = vperm.xlu1 %2764, %v3294_v50   ;;  %v624_v50 = vmul.f32 %v608_v20, %v3104_v0  ;;  %v769_v20 = vld [vmem:[%s4471_s3 + $0x78] sm:$0xff] }
 0x342   : > { %1080 = vperm.xlu1 %2764, %v3288_v49   ;;  %v583_v49 = vpop.permute.xlu0 %582 }
 0x343   : > { %v614_v6 = vmul.f32 %v583_v49, %v3162_v28  ;;  %v615_v59 = vmul.f32 %v583_v49, %v3165_v29 }
 0x346   : > { %1072 = vperm.xlu1 %2764, %v3301_v51   ;;  %v622_v51 = vmul.f32 %v603_v24, %v3110_v2  ;;  %v578_v0 = vpop.permute.xlu0 %577 }
 0x347   : > { %v612_v23 = vmul.f32 %v578_v0, %v3174_v34  ;;  %v613_v22 = vmul.f32 %v578_v0, %v3177_v35  ;;  %v754_v34 = vld [vmem:[%s4471_s3] sm:$0xff]  ;;  %v755_v35 = vld [vmem:[%s4471_s3 + $0x8] sm:$0xff] }
 0x34a   : > { %1064 = vperm.xlu1 %2764, %v3315_v53   ;;  %v573_v32 = vpop.permute.xlu0 %572 }
 0x34b   : > { %v611_v29 = vmul.f32 %v573_v32, %v3189_v41  ;;  %v610_v63 = vmul.f32 %v573_v32, %v3186_v40  ;;  %v756_v40 = vld [vmem:[%s4471_s3 + $0x10] sm:$0xff]  ;;  %v757_v41 = vld [vmem:[%s4471_s3 + $0x18] sm:$0xff] }
 0x387   : > { %v726_v47 = vpop.permute.xlu1 %725 }
 0x388   : > { %v749_v56 = vadd.f32 %v726_v47, %v621_v44  ;;  %v748_v58 = vadd.f32 %v726_v47, %v620_v48 }
 0x38b   : > { %v721_v38 = vpop.permute.xlu1 %720 }
 0x38c   : > { %v747_v37 = vadd.f32 %v721_v38, %v619_v1  ;;  %v746_v39 = vadd.f32 %v721_v38, %v618_v57 }
 0x38f   : > { %v736_v42 = vpop.permute.xlu1 %735 }
 0x390   : > { %v753_v54 = vadd.f32 %v736_v42, %v625_v52  ;;  %v752_v43 = vadd.f32 %v736_v42, %v624_v50 }
 0x391   : > { %v701_v31 = vpop.permute.xlu0 %700 }
 0x392   : > { %866 = vmatprep.subr.mxu1 %v753_v54  ;;  %v739_v27 = vadd.f32 %v701_v31, %v611_v29  ;;  %v738_v5 = vadd.f32 %v701_v31, %v610_v63 }
 0x393   : > { %867 = vmatpush1.msra.mxu1 %v752_v43  ;;  %v731_v53 = vpop.permute.xlu1 %730 }
 0x394   : > { %v750_v45 = vadd.f32 %v731_v53, %v622_v51  ;;  %v751_v46 = vadd.f32 %v731_v53, %v623_v55 }
 0x396   : > { %868 = vmatprep.subr.mxu1 %v751_v46  ;;  %v1113_v52 = vpop.permute.xlu0 %1112 }
 0x397   : > { %869 = vmatpush1.msra.mxu1 %v750_v45  ;;  %v716_v2 = vpop.permute.xlu1 %715 }
 0x398   : > { %870 = vmatprep.subr.mxu1 %v749_v56  ;;  %v745_v17 = vadd.f32 %v716_v2, %v617_v4  ;;  %v744_v60 = vadd.f32 %v716_v2, %v616_v7 }
 0x399   : > { %871 = vmatpush1.msra.mxu1 %v748_v58 }
 0x39a   : > { %872 = vmatprep.subr.mxu1 %v747_v37  ;;  %v3495_v51 = vpop.permute.xlu0 %1124 }
 0x39b   : > { %873 = vmatpush1.msra.mxu1 %v746_v39  ;;  %v711_v16 = vpop.permute.xlu1 %710 }
 0x39c   : > { %v742_v36 = vadd.f32 %v711_v16, %v614_v6  ;;  %v743_v30 = vadd.f32 %v711_v16, %v615_v59  ;;  %874 = vmatprep.subr.mxu1 %v745_v17 }
 0x39d   : > { %875 = vmatpush1.msra.mxu1 %v744_v60 }
 0x39e   : > { %876 = vmatprep.subr.mxu1 %v743_v30  ;;  %v3499_v46 = vpop.permute.xlu0 %1132 }
 0x39f   : > { %877 = vmatpush1.msra.mxu1 %v742_v36  ;;  %v706_v28 = vpop.permute.xlu1 %705 }
 0x3a0   : > { %v740_v26 = vadd.f32 %v706_v28, %v612_v23  ;;  %v741_v62 = vadd.f32 %v706_v28, %v613_v22 }
 0x3a2   : > { %878 = vmatprep.subr.mxu1 %v741_v62 }
 0x3a3   : > { %879 = vmatpush1.msra.mxu1 %v740_v26  ;;  %v1089_v57 = vpop.permute.xlu0 %1088 }
 0x3a4   : > { %880 = vmatprep.subr.mxu1 %v739_v27  ;;  %v1109_v21 = vpop.permute.xlu1 %1108 }
 0x3a5   : > { %881 = vmatpush1.msra.mxu1 %v738_v5 }
 0x3a6   : > { %2531 = vmatmul.mubr.msk.f32.vlgmr.msra.gmra.mxu1 %vm320_vm0, %v754_v34 }
 0x3a7   : > { %920 = vmatprep.mubr.f32.mxu1 %v4474_v15  ;;  %v1077_v7 = vpop.permute.xlu0 %1076 }
 0x3a8   : > { %v3481_v24 = vpop.permute.xlu1 %1116 }
 0x3aa   : > { %2532 = vmatmul.mubr.msk.f32.gmra.mxu1 %vm320_vm0, %v755_v35 }
 0x3ab   : > { %926 = vmatprep.mubr.f32.mxu1 %v4474_v15  ;;  %v1069_v28 = vpop.permute.xlu0 %1068 }
 0x3ac   : > { %v3489_v38 = vpop.permute.xlu1 %1120 }
 0x3ae   : > { %2533 = vmatmul.mubr.msk.f32.gmra.mxu1 %vm320_vm0, %v756_v40 }
 0x3af   : > { %932 = vmatprep.mubr.f32.mxu1 %v4474_v15 }
 0x3b0   : > { %v3493_v54 = vpop.permute.xlu1 %1128 }
 0x3b2   : > { %2534 = vmatmul.mubr.msk.f32.gmra.mxu1 %vm320_vm0, %v757_v41 }
 0x3b3   : > { %938 = vmatprep.mubr.f32.mxu1 %v4474_v15 }
 0x3b4   : > { %v3497_v44 = vpop.permute.xlu1 %1136 }
 0x3b6   : > { %2535 = vmatmul.mubr.msk.f32.gmra.mxu1 %vm320_vm0, %v758_v61 }
 0x3b7   : > { %944 = vmatprep.mubr.f32.mxu1 %v4474_v15 }
 0x3b9   : > { %v1085_v1 = vpop.permute.xlu1 %1084 }
 0x3ba   : > { %2536 = vmatmul.mubr.msk.f32.gmra.mxu1 %vm320_vm0, %v759_v3 }
 0x3bb   : > { %950 = vmatprep.mubr.f32.mxu1 %v4474_v15 }
 0x3bd   : > { %v1081_v4 = vpop.permute.xlu1 %1080 }
 0x3be   : > { %2537 = vmatmul.mubr.msk.f32.gmra.mxu1 %vm320_vm0, %v760_v8 }
 0x3bf   : > { %956 = vmatprep.mubr.f32.mxu1 %v4474_v15 }
 0x3c1   : > { %v1073_v36 = vpop.permute.xlu1 %1072 }
 0x3c2   : > { %2538 = vmatmul.mubr.msk.f32.gmra.mxu1 %vm320_vm0, %v761_v9  ;;  %v1061_v9 = vpop.permute.xlu0 %1060 }
 0x3c3   : > { %962 = vmatprep.mubr.f32.mxu1 %v4474_v15 }
 0x3c5   : > { %v1065_v40 = vpop.permute.xlu1 %1064 }
 0x3c6   : > { %2539 = vmatmul.mubr.msk.f32.gmra.mxu1 %vm320_vm0, %v762_v10 }
 0x3c7   : > { %968 = vmatprep.mubr.f32.mxu1 %v4474_v15 }
 0x3ca   : > { %2540 = vmatmul.mubr.msk.f32.gmra.mxu1 %vm320_vm0, %v763_v11 }
 0x3cb   : > { %974 = vmatprep.mubr.f32.mxu1 %v4474_v15 }
 0x3ce   : > { %2541 = vmatmul.mubr.msk.f32.gmra.mxu1 %vm320_vm0, %v764_v12 }
 0x3cf   : > { %980 = vmatprep.mubr.f32.mxu1 %v4474_v15 }
 0x3d2   : > { %2542 = vmatmul.mubr.msk.f32.gmra.mxu1 %vm320_vm0, %v765_v13 }
 0x3d3   : > { %986 = vmatprep.mubr.f32.mxu1 %v4474_v15 }
 0x3d6   : > { %2543 = vmatmul.mubr.msk.f32.gmra.mxu1 %vm320_vm0, %v766_v14 }
 0x3d7   : > { %992 = vmatprep.mubr.f32.mxu1 %v4474_v15 }
 0x3da   : > { %2544 = vmatmul.mubr.msk.f32.gmra.mxu1 %vm320_vm0, %v767_v18 }
 0x3db   : > { %998 = vmatprep.mubr.f32.mxu1 %v4474_v15 }
 0x3de   : > { %2545 = vmatmul.mubr.msk.f32.gmra.mxu1 %vm320_vm0, %v768_v19 }
 0x3df   : > { %1004 = vmatprep.mubr.f32.mxu1 %v4474_v15 }
 0x3e2   : > { %2546 = vmatmul.mubr.msk.f32.gmra.mxu1 %vm320_vm0, %v769_v20 }
 0x3e3   : > { %1010 = vmatprep.mubr.f32.mxu1 %v4474_v15 }
 0x466   : > { %v3483_v25 = vpop.f32.mrf.mxu1 }
 0x467   : > { %v1091_v19 = vadd.f32 %v1061_v9, %v3483_v25 }
 0x468   : > { %v3485_v47 = vpop.f32.mrf.mxu1 }
 0x469   : > { %v1092_v14 = vadd.f32 %v1061_v9, %v3485_v47 }
 0x46a   : > { %v3487_v33 = vpop.f32.mrf.mxu1 }
 0x46b   : > { %v1093_v12 = vadd.f32 %v1065_v40, %v3487_v33 }
 0x46c   : > { %v3491_v50 = vpop.f32.mrf.mxu1 }
 0x46d   : > { %v1094_v10 = vadd.f32 %v1065_v40, %v3491_v50 }
 0x46e   : > { %v928_v49 = vpop.f32.mrf.mxu1 }
 0x46f   : > { %v1095_v3 = vadd.f32 %v1069_v28, %v928_v49 }
 0x470   : > { %v930_v42 = vpop.f32.mrf.mxu1 }
 0x471   : > { %v1096_v41 = vadd.f32 %v1069_v28, %v930_v42 }
 0x472   : > { %v934_v43 = vpop.f32.mrf.mxu1 }
 0x473   : > { %v1097_v34 = vadd.f32 %v1073_v36, %v934_v43 }
 0x474   : > { %v936_v55 = vpop.f32.mrf.mxu1 }
 0x475   : > { %v1098_v27 = vadd.f32 %v1073_v36, %v936_v55 }
 0x476   : > { %v940_v53 = vpop.f32.mrf.mxu1 }
 0x477   : > { %v1099_v62 = vadd.f32 %v1077_v7, %v940_v53 }
 0x478   : > { %v942_v45 = vpop.f32.mrf.mxu1 }
 0x479   : > { %v1100_v29 = vadd.f32 %v1077_v7, %v942_v45 }
 0x47a   : > { %v946_v48 = vpop.f32.mrf.mxu1 }
 0x47b   : > { %v1101_v22 = vadd.f32 %v1081_v4, %v946_v48 }
 0x47c   : > { %v948_v0 = vpop.f32.mrf.mxu1 }
 0x47d   : > { %v1102_v30 = vadd.f32 %v1081_v4, %v948_v0 }
 0x47e   : > { %v952_v56 = vpop.f32.mrf.mxu1 }
 0x47f   : > { %v1103_v60 = vadd.f32 %v1085_v1, %v952_v56 }
 0x480   : > { %v954_v58 = vpop.f32.mrf.mxu1 }
 0x481   : > { %v1104_v17 = vadd.f32 %v1085_v1, %v954_v58 }
 0x482   : > { %v958_v2 = vpop.f32.mrf.mxu1 }
 0x483   : > { %v1105_v6 = vadd.f32 %v1089_v57, %v958_v2 }
 0x484   : > { %v960_v37 = vpop.f32.mrf.mxu1 }
 0x485   : > { %v1106_v39 = vadd.f32 %v1089_v57, %v960_v37 }
 0x486   : > { %v964_v59 = vpop.f32.mrf.mxu1 }
 0x487   : > { %v1139_v32 = vadd.f32 %v1109_v21, %v964_v59  ;;  %1459 = vmatprep.subr.mxu0 %v1106_v39 }
 0x488   : > { %v966_v16 = vpop.f32.mrf.mxu1  ;;  %1460 = vmatpush1.msra.mxu0 %v1105_v6 }
 0x489   : > { %v1140_v23 = vadd.f32 %v1109_v21, %v966_v16  ;;  %1203 = vxpose.xlu1.b32.start [1/8] (short) %v1139_v32, 128  ;;  %1461 = vmatprep.subr.mxu0 %v1104_v17 }
 0x48a   : > { %v970_v31 = vpop.f32.mrf.mxu1  ;;  %1462 = vmatpush1.msra.mxu0 %v1103_v60 }
 0x48b   : > { %v1141_v26 = vadd.f32 %v1113_v52, %v970_v31  ;;  %1235 = vxpose.xlu0.b32.start [1/8] (short) %v1140_v23, 128  ;;  %1463 = vmatprep.subr.mxu0 %v1102_v30 }
 0x48c   : > { %v972_v63 = vpop.f32.mrf.mxu1  ;;  %1464 = vmatpush1.msra.mxu0 %v1101_v22 }
 0x48d   : > { %v1142_v5 = vadd.f32 %v1113_v52, %v972_v63  ;;  %1204 = vxpose.xlu1.b32.cont [2/8] (short) %v1141_v26, 128  ;;  %1465 = vmatprep.subr.mxu0 %v1100_v29 }
 0x48e   : > { %v976_v35 = vpop.f32.mrf.mxu1  ;;  %1466 = vmatpush1.msra.mxu0 %v1099_v62 }
 0x48f   : > { %v1143_v61 = vadd.f32 %v3481_v24, %v976_v35  ;;  %1236 = vxpose.xlu0.b32.cont [2/8] (short) %v1142_v5, 128  ;;  %1467 = vmatprep.subr.mxu0 %v1098_v27 }
 0x490   : > { %v978_v8 = vpop.f32.mrf.mxu1  ;;  %1468 = vmatpush1.msra.mxu0 %v1097_v34 }
 0x491   : > { %v1144_v11 = vadd.f32 %v3481_v24, %v978_v8  ;;  %1205 = vxpose.xlu1.b32.cont [3/8] (short) %v1143_v61, 128  ;;  %1469 = vmatprep.subr.mxu0 %v1096_v41 }
 0x492   : > { %v982_v13 = vpop.f32.mrf.mxu1  ;;  %1470 = vmatpush1.msra.mxu0 %v1095_v3 }
 0x493   : > { %v1145_v18 = vadd.f32 %v3489_v38, %v982_v13  ;;  %1237 = vxpose.xlu0.b32.cont [3/8] (short) %v1144_v11, 128  ;;  %1471 = vmatprep.subr.mxu0 %v1094_v10 }
 0x494   : > { %v984_v20 = vpop.f32.mrf.mxu1  ;;  %1472 = vmatpush1.msra.mxu0 %v1093_v12 }
 0x495   : > { %v1146_v21 = vadd.f32 %v3489_v38, %v984_v20  ;;  %1206 = vxpose.xlu1.b32.cont [4/8] (short) %v1145_v18, 128  ;;  %1473 = vmatprep.subr.mxu0 %v1092_v14 }
 0x496   : > { %v988_v24 = vpop.f32.mrf.mxu1  ;;  %1474 = vmatpush1.msra.mxu0 %v1091_v19 }
 0x497   : > { %v1147_v33 = vadd.f32 %v3495_v51, %v988_v24  ;;  %1238 = vxpose.xlu0.b32.cont [4/8] (short) %v1146_v21, 128 }
 0x498   : > { %v990_v50 = vpop.f32.mrf.mxu1 }
 0x499   : > { %v1148_v47 = vadd.f32 %v3495_v51, %v990_v50  ;;  %1207 = vxpose.xlu1.b32.cont [5/8] (short) %v1147_v33, 128  ;;  %v770_v50 = vld [vmem:[%s4471_s3 + $0x80] sm:$0xff] }
 0x49a   : > { %v994_v52 = vpop.f32.mrf.mxu1  ;;  %2547 = vmatmul.mubr.msk.f32.gmra.mxu1 %vm320_vm0, %v770_v50 }
 0x49b   : > { %v1149_v49 = vadd.f32 %v3493_v54, %v994_v52  ;;  %1239 = vxpose.xlu0.b32.cont [5/8] (short) %v1148_v47, 128  ;;  %1016 = vmatprep.mubr.f32.mxu1 %v4474_v15  ;;  %v771_v52 = vld [vmem:[%s4471_s3 + $0x88] sm:$0xff] }
 0x49c   : > { %v996_v25 = vpop.f32.mrf.mxu1 }
 0x49d   : > { %v1150_v42 = vadd.f32 %v3493_v54, %v996_v25  ;;  %1208 = vxpose.xlu1.b32.cont [6/8] (short) %v1149_v49, 128  ;;  %v772_v25 = vld [vmem:[%s4471_s3 + $0x90] sm:$0xff] }
 0x49e   : > { %v1000_v38 = vpop.f32.mrf.mxu1  ;;  %2548 = vmatmul.mubr.msk.f32.gmra.mxu1 %vm320_vm0, %v771_v52 }
 0x49f   : > { %v1151_v43 = vadd.f32 %v3499_v46, %v1000_v38  ;;  %1240 = vxpose.xlu0.b32.cont [6/8] (short) %v1150_v42, 128  ;;  %1022 = vmatprep.mubr.f32.mxu1 %v4474_v15  ;;  %v773_v38 = vld [vmem:[%s4471_s3 + $0x98] sm:$0xff] }
 0x4a0   : > { %v1002_v55 = vpop.f32.mrf.mxu1 }
 0x4a1   : > { %v1152_v53 = vadd.f32 %v3499_v46, %v1002_v55  ;;  %1209 = vxpose.xlu1.b32.cont [7/8] (short) %v1151_v43, 128  ;;  %v774_v55 = vld [vmem:[%s4471_s3 + $0xa0] sm:$0xff] }
 0x4a2   : > { %v1006_v45 = vpop.f32.mrf.mxu1  ;;  %2549 = vmatmul.mubr.msk.f32.gmra.mxu1 %vm320_vm0, %v772_v25 }
 0x4a3   : > { %v1153_v51 = vadd.f32 %v3497_v44, %v1006_v45  ;;  %1241 = vxpose.xlu0.b32.cont [7/8] (short) %v1152_v53, 128  ;;  %1028 = vmatprep.mubr.f32.mxu1 %v4474_v15  ;;  %v775_v45 = vld [vmem:[%s4471_s3 + $0xa8] sm:$0xff] }
 0x4a4   : > { %v1008_v48 = vpop.f32.mrf.mxu1 }
 0x4a5   : > { %v1154_v0 = vadd.f32 %v3497_v44, %v1008_v48  ;;  %1210 = vxpose.xlu1.b32.end [8/8] (short) %v1153_v51, 128  ;;  %v776_v48 = vld [vmem:[%s4471_s3 + $0xb0] sm:$0xff] }
 0x4a6   : > { %2550 = vmatmul.mubr.msk.f32.gmra.mxu1 %vm320_vm0, %v773_v38 }
 0x4a7   : > { %1242 = vxpose.xlu0.b32.end [8/8] (short) %v1154_v0, 128  ;;  %1034 = vmatprep.mubr.f32.mxu1 %v4474_v15 }
 0x4aa   : > { %2551 = vmatmul.mubr.msk.f32.gmra.mxu1 %vm320_vm0, %v774_v55 }
 0x4ab   : > { %1040 = vmatprep.mubr.f32.mxu1 %v4474_v15 }
 0x4ae   : > { %2552 = vmatmul.mubr.msk.f32.gmra.mxu1 %vm320_vm0, %v775_v45 }
 0x4af   : > { %1046 = vmatprep.mubr.f32.mxu1 %v4474_v15 }
 0x4b2   : > { %2553 = vmatmul.mubr.msk.f32.gmra.mxu1 %vm320_vm0, %v776_v48 }
 0x4b3   : > { %1052 = vmatprep.mubr.f32.mxu1 %v4474_v15 }
 0x505   : > { %v1219_v1 = vpop.trf.xlu1 }
 0x506   : > { %1267 = vst.msk [vmem:[#allocation2] sm:$0xff] %vm320_vm0, %v1219_v1  ;;  %v777_v1 = vld [vmem:[%s4471_s3 + $0xb8] sm:$0xff] }
 0x507   : > { %v1251_v54 = vpop.trf.xlu0  ;;  %2554 = vmatmul.mubr.msk.f32.gmra.mxu1 %vm320_vm0, %v777_v1 }
 0x508   : > { %1283 = vst.msk [vmem:[#allocation2 + $0x80] sm:$0xff] %vm320_vm0, %v1251_v54 }
 0x509   : > { %v1220_v56 = vpop.trf.xlu1 }
 0x50a   : > { %1268 = vst.msk [vmem:[#allocation2 + $0x8] sm:$0xff] %vm320_vm0, %v1220_v56 }
 0x50b   : > { %v1252_v46 = vpop.trf.xlu0 }
 0x50c   : > { %1284 = vst.msk [vmem:[#allocation2 + $0x88] sm:$0xff] %vm320_vm0, %v1252_v46 }
 0x50d   : > { %v1221_v57 = vpop.trf.xlu1  ;;  %v1315_v58 = vld [vmem:[#allocation2] sm:$0xff] }
 0x50e   : > { %1269 = vst.msk [vmem:[#allocation2 + $0x10] sm:$0xff] %vm320_vm0, %v1221_v57  ;;  %2555 = vmatmul.mubr.msk.f32.vlgmr.msra.gmra.mxu0 %vm320_vm0, %v1315_v58 }
 0x50f   : > { %1513 = vmatprep.mubr.f32.mxu0 %v4474_v15  ;;  %v1253_v44 = vpop.trf.xlu0  ;;  %v1331_v33 = vld [vmem:[#allocation2 + $0x80] sm:$0xff] }
 0x510   : > { %1285 = vst.msk [vmem:[#allocation2 + $0x90] sm:$0xff] %vm320_vm0, %v1253_v44 }
 0x511   : > { %v1222_v2 = vpop.trf.xlu1  ;;  %v1316_v4 = vld [vmem:[#allocation2 + $0x8] sm:$0xff] }
 0x512   : > { %1270 = vst.msk [vmem:[#allocation2 + $0x18] sm:$0xff] %vm320_vm0, %v1222_v2  ;;  %2556 = vmatmul.mubr.msk.f32.gmra.mxu0 %vm320_vm0, %v1316_v4 }
 0x513   : > { %1519 = vmatprep.mubr.f32.mxu0 %v4474_v15  ;;  %v1254_v37 = vpop.trf.xlu0  ;;  %v1332_v47 = vld [vmem:[#allocation2 + $0x88] sm:$0xff] }
 0x514   : > { %1286 = vst.msk [vmem:[#allocation2 + $0x98] sm:$0xff] %vm320_vm0, %v1254_v37  ;;  %v3013_v37 = vmov 4  }
 0x515   : > { %v1223_v7 = vpop.trf.xlu1  ;;  %v1317_v39 = vld [vmem:[#allocation2 + $0x10] sm:$0xff]  ;;  %2766 = vset.pattern.permute.xlu1 %v3013_v37  ;;  %2765 = vset.pattern.permute.xlu0 %v3013_v37 }
 0x516   : > { %1271 = vst.msk [vmem:[#allocation2 + $0x20] sm:$0xff] %vm320_vm0, %v1223_v7  ;;  %2557 = vmatmul.mubr.msk.f32.gmra.mxu0 %vm320_vm0, %v1317_v39  ;;  %v2921_v7 = vld [vmem:[%s4469_s1 + $0x18] sm:$0xff]  ;;  %v2922_v39 = vld [vmem:[%s4469_s1 + $0x10] sm:$0xff] }
 0x517   : > { %1525 = vmatprep.mubr.f32.mxu0 %v4474_v15  ;;  %v1255_v6 = vpop.trf.xlu0  ;;  %v1333_v49 = vld [vmem:[#allocation2 + $0x90] sm:$0xff]  ;;  %1168 = vperm.xlu1 %2766, %v2921_v7  }
 0x518   : > { %1287 = vst.msk [vmem:[#allocation2 + $0xa0] sm:$0xff] %vm320_vm0, %v1255_v6  ;;  %1164 = vperm.xlu0 %2765, %v2922_v39   ;;  %v2923_v6 = vld [vmem:[%s4469_s1 + $0x20] sm:$0xff] }
 0x519   : > { %v1224_v59 = vpop.trf.xlu1  ;;  %v1318_v17 = vld [vmem:[#allocation2 + $0x18] sm:$0xff] }
 0x51a   : > { %1272 = vst.msk [vmem:[#allocation2 + $0x28] sm:$0xff] %vm320_vm0, %v1224_v59  ;;  %2558 = vmatmul.mubr.msk.f32.gmra.mxu0 %vm320_vm0, %v1318_v17  ;;  %v2924_v59 = vld [vmem:[%s4469_s1 + $0x28] sm:$0xff]  ;;  %v2925_v17 = vld [vmem:[%s4469_s1 + $0x30] sm:$0xff] }
 0x51b   : > { %1531 = vmatprep.mubr.f32.mxu0 %v4474_v15  ;;  %v1256_v32 = vpop.trf.xlu0  ;;  %v1334_v42 = vld [vmem:[#allocation2 + $0x98] sm:$0xff]  ;;  %1172 = vperm.xlu1 %2766, %v2923_v6  }
 0x51c   : > { %1288 = vst.msk [vmem:[#allocation2 + $0xa8] sm:$0xff] %vm320_vm0, %v1256_v32  ;;  %1176 = vperm.xlu0 %2765, %v2924_v59   ;;  %v2926_v32 = vld [vmem:[%s4469_s1 + $0x38] sm:$0xff] }
 0x51d   : > { %v1225_v60 = vpop.trf.xlu1  ;;  %v1319_v16 = vld [vmem:[#allocation2 + $0x20] sm:$0xff] }
 0x51e   : > { %1273 = vst.msk [vmem:[#allocation2 + $0x30] sm:$0xff] %vm320_vm0, %v1225_v60  ;;  %2559 = vmatmul.mubr.msk.f32.gmra.mxu0 %vm320_vm0, %v1319_v16  ;;  %v2927_v60 = vld [vmem:[%s4469_s1] sm:$0xff]  ;;  %v2928_v16 = vld [vmem:[%s4469_s1 + $0x8] sm:$0xff] }
 0x51f   : > { %1537 = vmatprep.mubr.f32.mxu0 %v4474_v15  ;;  %v1257_v36 = vpop.trf.xlu0  ;;  %v1335_v43 = vld [vmem:[#allocation2 + $0xa0] sm:$0xff]  ;;  %1180 = vperm.xlu1 %2766, %v2925_v17  }
 0x520   : > { %1289 = vst.msk [vmem:[#allocation2 + $0xb0] sm:$0xff] %vm320_vm0, %v1257_v36  ;;  %1184 = vperm.xlu0 %2765, %v2926_v32  }
 0x521   : > { %v1226_v30 = vpop.trf.xlu1  ;;  %v1320_v23 = vld [vmem:[#allocation2 + $0x28] sm:$0xff] }
 0x522   : > { %1274 = vst.msk [vmem:[#allocation2 + $0x38] sm:$0xff] %vm320_vm0, %v1226_v30  ;;  %2560 = vmatmul.mubr.msk.f32.gmra.mxu0 %vm320_vm0, %v1320_v23 }
 0x523   : > { %1543 = vmatprep.mubr.f32.mxu0 %v4474_v15  ;;  %v1258_v22 = vpop.trf.xlu0  ;;  %v1336_v53 = vld [vmem:[#allocation2 + $0xa8] sm:$0xff]  ;;  %1156 = vperm.xlu1 %2766, %v2927_v60  }
 0x524   : > { %1290 = vst.msk [vmem:[#allocation2 + $0xb8] sm:$0xff] %vm320_vm0, %v1258_v22  ;;  %1160 = vperm.xlu0 %2765, %v2928_v16  }
 0x525   : > { %v1227_v31 = vpop.trf.xlu1  ;;  %v1321_v28 = vld [vmem:[#allocation2 + $0x30] sm:$0xff] }
 0x526   : > { %1275 = vst.msk [vmem:[#allocation2 + $0x40] sm:$0xff] %vm320_vm0, %v1227_v31  ;;  %2561 = vmatmul.mubr.msk.f32.gmra.mxu0 %vm320_vm0, %v1321_v28 }
 0x527   : > { %1549 = vmatprep.mubr.f32.mxu0 %v4474_v15  ;;  %v1259_v29 = vpop.trf.xlu0  ;;  %v1337_v51 = vld [vmem:[#allocation2 + $0xb0] sm:$0xff] }
 0x528   : > { %1291 = vst.msk [vmem:[#allocation2 + $0xc0] sm:$0xff] %vm320_vm0, %v1259_v29 }
 0x529   : > { %v1228_v26 = vpop.trf.xlu1  ;;  %v1322_v62 = vld [vmem:[#allocation2 + $0x38] sm:$0xff] }
 0x52a   : > { %1276 = vst.msk [vmem:[#allocation2 + $0x48] sm:$0xff] %vm320_vm0, %v1228_v26  ;;  %2562 = vmatmul.mubr.msk.f32.gmra.mxu0 %vm320_vm0, %v1322_v62 }
 0x52b   : > { %1555 = vmatprep.mubr.f32.mxu0 %v4474_v15  ;;  %v1260_v63 = vpop.trf.xlu0  ;;  %v1338_v0 = vld [vmem:[#allocation2 + $0xb8] sm:$0xff] }
 0x52c   : > { %1292 = vst.msk [vmem:[#allocation2 + $0xc8] sm:$0xff] %vm320_vm0, %v1260_v63 }
 0x52d   : > { %v1229_v27 = vpop.trf.xlu1  ;;  %v1323_v5 = vld [vmem:[#allocation2 + $0x40] sm:$0xff] }
 0x52e   : > { %1277 = vst.msk [vmem:[#allocation2 + $0x50] sm:$0xff] %vm320_vm0, %v1229_v27  ;;  %2563 = vmatmul.mubr.msk.f32.gmra.mxu0 %vm320_vm0, %v1323_v5 }
 0x52f   : > { %1561 = vmatprep.mubr.f32.mxu0 %v4474_v15  ;;  %v1261_v34 = vpop.trf.xlu0  ;;  %v1339_v54 = vld [vmem:[#allocation2 + $0xc0] sm:$0xff] }
 0x530   : > { %1293 = vst.msk [vmem:[#allocation2 + $0xd0] sm:$0xff] %vm320_vm0, %v1261_v34 }
 0x531   : > { %v1230_v35 = vpop.trf.xlu1  ;;  %v1324_v40 = vld [vmem:[#allocation2 + $0x48] sm:$0xff] }
 0x532   : > { %1278 = vst.msk [vmem:[#allocation2 + $0x58] sm:$0xff] %vm320_vm0, %v1230_v35  ;;  %2564 = vmatmul.mubr.msk.f32.gmra.mxu0 %vm320_vm0, %v1324_v40 }
 0x533   : > { %1567 = vmatprep.mubr.f32.mxu0 %v4474_v15  ;;  %v1262_v41 = vpop.trf.xlu0  ;;  %v1340_v56 = vld [vmem:[#allocation2 + $0xc8] sm:$0xff] }
 0x534   : > { %1294 = vst.msk [vmem:[#allocation2 + $0xd8] sm:$0xff] %vm320_vm0, %v1262_v41 }
 0x535   : > { %v1231_v61 = vpop.trf.xlu1  ;;  %v1325_v3 = vld [vmem:[#allocation2 + $0x50] sm:$0xff] }
 0x536   : > { %1279 = vst.msk [vmem:[#allocation2 + $0x60] sm:$0xff] %vm320_vm0, %v1231_v61  ;;  %2565 = vmatmul.mubr.msk.f32.gmra.mxu0 %vm320_vm0, %v1325_v3 }
 0x537   : > { %1573 = vmatprep.mubr.f32.mxu0 %v4474_v15  ;;  %v1263_v8 = vpop.trf.xlu0  ;;  %v1341_v46 = vld [vmem:[#allocation2 + $0xd0] sm:$0xff] }
 0x538   : > { %1295 = vst.msk [vmem:[#allocation2 + $0xe0] sm:$0xff] %vm320_vm0, %v1263_v8 }
 0x539   : > { %v1232_v9 = vpop.trf.xlu1  ;;  %v1326_v10 = vld [vmem:[#allocation2 + $0x58] sm:$0xff] }
 0x53a   : > { %1280 = vst.msk [vmem:[#allocation2 + $0x68] sm:$0xff] %vm320_vm0, %v1232_v9  ;;  %2566 = vmatmul.mubr.msk.f32.gmra.mxu0 %vm320_vm0, %v1326_v10 }
 0x53b   : > { %1579 = vmatprep.mubr.f32.mxu0 %v4474_v15  ;;  %v1264_v11 = vpop.trf.xlu0  ;;  %v1342_v57 = vld [vmem:[#allocation2 + $0xd8] sm:$0xff] }
 0x53c   : > { %1296 = vst.msk [vmem:[#allocation2 + $0xe8] sm:$0xff] %vm320_vm0, %v1264_v11 }
 0x53d   : > { %v1233_v12 = vpop.trf.xlu1  ;;  %v1327_v13 = vld [vmem:[#allocation2 + $0x60] sm:$0xff] }
 0x53e   : > { %1281 = vst.msk [vmem:[#allocation2 + $0x70] sm:$0xff] %vm320_vm0, %v1233_v12  ;;  %2567 = vmatmul.mubr.msk.f32.gmra.mxu0 %vm320_vm0, %v1327_v13 }
 0x53f   : > { %1585 = vmatprep.mubr.f32.mxu0 %v4474_v15  ;;  %v1265_v14 = vpop.trf.xlu0  ;;  %v1343_v58 = vld [vmem:[#allocation2 + $0xe0] sm:$0xff] }
 0x540   : > { %1297 = vst.msk [vmem:[#allocation2 + $0xf0] sm:$0xff] %vm320_vm0, %v1265_v14 }
 0x541   : > { %v1234_v18 = vpop.trf.xlu1  ;;  %v1328_v19 = vld [vmem:[#allocation2 + $0x68] sm:$0xff] }
 0x542   : > { %1282 = vst.msk [vmem:[#allocation2 + $0x78] sm:$0xff] %vm320_vm0, %v1234_v18  ;;  %2568 = vmatmul.mubr.msk.f32.gmra.mxu0 %vm320_vm0, %v1328_v19 }
 0x543   : > { %1591 = vmatprep.mubr.f32.mxu0 %v4474_v15  ;;  %v1266_v20 = vpop.trf.xlu0  ;;  %v1344_v44 = vld [vmem:[#allocation2 + $0xe8] sm:$0xff] }
 0x544   : > { %1298 = vst.msk [vmem:[#allocation2 + $0xf8] sm:$0xff] %vm320_vm0, %v1266_v20 }
 0x545   : > { %v1329_v21 = vld [vmem:[#allocation2 + $0x70] sm:$0xff] }
 0x546   : > { %2569 = vmatmul.mubr.msk.f32.gmra.mxu0 %vm320_vm0, %v1329_v21 }
 0x547   : > { %1597 = vmatprep.mubr.f32.mxu0 %v4474_v15  ;;  %v1345_v2 = vld [vmem:[#allocation2 + $0xf0] sm:$0xff] }
 0x549   : > { %v1330_v24 = vld [vmem:[#allocation2 + $0x78] sm:$0xff] }
 0x54a   : > { %2570 = vmatmul.mubr.msk.f32.gmra.mxu0 %vm320_vm0, %v1330_v24 }
 0x54b   : > { %1603 = vmatprep.mubr.f32.mxu0 %v4474_v15  ;;  %v1346_v4 = vld [vmem:[#allocation2 + $0xf8] sm:$0xff] }
 0x54e   : > { %2571 = vmatmul.mubr.msk.f32.gmra.mxu0 %vm320_vm0, %v1331_v33 }
 0x54f   : > { %1609 = vmatprep.mubr.f32.mxu0 %v4474_v15 }
 0x552   : > { %2572 = vmatmul.mubr.msk.f32.gmra.mxu0 %vm320_vm0, %v1332_v47 }
 0x553   : > { %1615 = vmatprep.mubr.f32.mxu0 %v4474_v15 }
 0x556   : > { %2573 = vmatmul.mubr.msk.f32.gmra.mxu0 %vm320_vm0, %v1333_v49 }
 0x557   : > { %1621 = vmatprep.mubr.f32.mxu0 %v4474_v15 }
 0x55a   : > { %2574 = vmatmul.mubr.msk.f32.gmra.mxu0 %vm320_vm0, %v1334_v42 }
 0x55b   : > { %1627 = vmatprep.mubr.f32.mxu0 %v4474_v15 }
 0x55e   : > { %2575 = vmatmul.mubr.msk.f32.gmra.mxu0 %vm320_vm0, %v1335_v43 }
 0x55f   : > { %1633 = vmatprep.mubr.f32.mxu0 %v4474_v15 }
 0x562   : > { %2576 = vmatmul.mubr.msk.f32.gmra.mxu0 %vm320_vm0, %v1336_v53 }
 0x563   : > { %1639 = vmatprep.mubr.f32.mxu0 %v4474_v15 }
 0x566   : > { %2577 = vmatmul.mubr.msk.f32.gmra.mxu0 %vm320_vm0, %v1337_v51 }
 0x567   : > { %1645 = vmatprep.mubr.f32.mxu0 %v4474_v15 }
 0x56a   : > { %2578 = vmatmul.mubr.msk.f32.gmra.mxu0 %vm320_vm0, %v1338_v0 }
 0x56b   : > { %1651 = vmatprep.mubr.f32.mxu0 %v4474_v15 }
 0x56e   : > { %2579 = vmatmul.mubr.msk.f32.gmra.mxu0 %vm320_vm0, %v1339_v54 }
 0x56f   : > { %1657 = vmatprep.mubr.f32.mxu0 %v4474_v15 }
 0x572   : > { %2580 = vmatmul.mubr.msk.f32.gmra.mxu0 %vm320_vm0, %v1340_v56 }
 0x573   : > { %1663 = vmatprep.mubr.f32.mxu0 %v4474_v15 }
 0x576   : > { %2581 = vmatmul.mubr.msk.f32.gmra.mxu0 %vm320_vm0, %v1341_v46 }
 0x577   : > { %1669 = vmatprep.mubr.f32.mxu0 %v4474_v15 }
 0x57a   : > { %2582 = vmatmul.mubr.msk.f32.gmra.mxu0 %vm320_vm0, %v1342_v57 }
 0x57b   : > { %1675 = vmatprep.mubr.f32.mxu0 %v4474_v15 }
 0x57e   : > { %2583 = vmatmul.mubr.msk.f32.gmra.mxu0 %vm320_vm0, %v1343_v58 }
 0x57f   : > { %1681 = vmatprep.mubr.f32.mxu0 %v4474_v15 }
 0x582   : > { %2584 = vmatmul.mubr.msk.f32.gmra.mxu0 %vm320_vm0, %v1344_v44 }
 0x583   : > { %1687 = vmatprep.mubr.f32.mxu0 %v4474_v15 }
 0x586   : > { %2585 = vmatmul.mubr.msk.f32.gmra.mxu0 %vm320_vm0, %v1345_v2 }
 0x587   : > { %1693 = vmatprep.mubr.f32.mxu0 %v4474_v15 }
 0x58a   : > { %2586 = vmatmul.mubr.msk.f32.gmra.mxu0 %vm320_vm0, %v1346_v4 }
 0x5ce   : > { %v3675_v36 = vpop.f32.mrf.mxu0 }
 0x5d0   : > { %v3677_v30 = vpop.f32.mrf.mxu0 }
 0x5d2   : > { %v3679_v23 = vpop.f32.mrf.mxu0 }
 0x5d4   : > { %v3681_v22 = vpop.f32.mrf.mxu0 }
 0x5d5   : > { %4505 = vst [vmem:[#allocation7_spill] sm:$0xff] %v3681_v22 }
 0x5d6   : > { %v3683_v31 = vpop.f32.mrf.mxu0 }
 0x5d7   : > { %v1700_v57 = vmax.f32 %v3675_v36, %v3683_v31 }
 0x5d8   : > { %v3685_v28 = vpop.f32.mrf.mxu0 }
 0x5d9   : > { %4506 = vst [vmem:[#allocation8_spill] sm:$0xff] %v3685_v28 }
 0x5da   : > { %v3687_v29 = vpop.f32.mrf.mxu0 }
 0x5db   : > { %v1701_v58 = vmax.f32 %v3679_v23, %v3687_v29 }
 0x5dc   : > { %v3689_v26 = vpop.f32.mrf.mxu0 }
 0x5dd   : > { %4507 = vst [vmem:[#allocation9_spill] sm:$0xff] %v3689_v26 }
 0x5de   : > { %v3691_v62 = vpop.f32.mrf.mxu0 }
 0x5df   : > { %v1702_v2 = vmax.f32 %v1700_v57, %v3691_v62 }
 0x5e0   : > { %v3693_v63 = vpop.f32.mrf.mxu0 }
 0x5e2   : > { %v3695_v27 = vpop.f32.mrf.mxu0 }
 0x5e3   : > { %v1703_v4 = vmax.f32 %v1701_v58, %v3695_v27 }
 0x5e4   : > { %v3697_v5 = vpop.f32.mrf.mxu0 }
 0x5e5   : > { %4508 = vst [vmem:[#allocation10_spill] sm:$0xff] %v3697_v5 }
 0x5e6   : > { %v3699_v34 = vpop.f32.mrf.mxu0 }
 0x5e7   : > { %v1704_v7 = vmax.f32 %v1702_v2, %v3699_v34 }
 0x5e8   : > { %v3701_v35 = vpop.f32.mrf.mxu0 }
 0x5ea   : > { %v3703_v40 = vpop.f32.mrf.mxu0 }
 0x5eb   : > { %v1705_v39 = vmax.f32 %v1703_v4, %v3703_v40 }
 0x5ec   : > { %v3705_v41 = vpop.f32.mrf.mxu0 }
 0x5ed   : > { %4509 = vst [vmem:[#allocation11_spill] sm:$0xff] %v3705_v41 }
 0x5ee   : > { %v3707_v61 = vpop.f32.mrf.mxu0 }
 0x5ef   : > { %4510 = vst [vmem:[#allocation12_spill] sm:$0xff] %v3707_v61  ;;  %v1706_v59 = vmax.f32 %v1704_v7, %v3707_v61 }
 0x5f0   : > { %v3709_v3 = vpop.f32.mrf.mxu0 }
 0x5f2   : > { %v3711_v8 = vpop.f32.mrf.mxu0 }
 0x5f3   : > { %v1707_v17 = vmax.f32 %v1705_v39, %v3711_v8 }
 0x5f4   : > { %v3713_v9 = vpop.f32.mrf.mxu0 }
 0x5f5   : > { %4511 = vst [vmem:[#allocation13_spill] sm:$0xff] %v3713_v9 }
 0x5f6   : > { %v3715_v10 = vpop.f32.mrf.mxu0 }
 0x5f7   : > { %4512 = vst [vmem:[#allocation14_spill] sm:$0xff] %v3715_v10  ;;  %v1708_v60 = vmax.f32 %v1706_v59, %v3715_v10 }
 0x5f8   : > { %v3717_v11 = vpop.f32.mrf.mxu0 }
 0x5f9   : > { %4513 = vst [vmem:[#allocation15_spill] sm:$0xff] %v3717_v11 }
 0x5fa   : > { %v3719_v12 = vpop.f32.mrf.mxu0 }
 0x5fb   : > { %v1709_v16 = vmax.f32 %v1707_v17, %v3719_v12  ;;  %v1738_v17 = vmax.f32 %v3681_v22, %v3689_v26 }
 0x5fc   : > { %v3721_v13 = vpop.f32.mrf.mxu0 }
 0x5fd   : > { %4514 = vst [vmem:[#allocation16_spill] sm:$0xff] %v3721_v13 }
 0x5fe   : > { %v3723_v14 = vpop.f32.mrf.mxu0 }
 0x5ff   : > { %v1710_v58 = vmax.f32 %v1708_v60, %v3723_v14 }
 0x600   : > { %v3725_v18 = vpop.f32.mrf.mxu0 }
 0x602   : > { %v3727_v19 = vpop.f32.mrf.mxu0 }
 0x603   : > { %4515 = vst [vmem:[#allocation17_spill] sm:$0xff] %v3727_v19  ;;  %v1711_v2 = vmax.f32 %v1709_v16, %v3727_v19 }
 0x604   : > { %v3729_v20 = vpop.f32.mrf.mxu0 }
 0x606   : > { %v3731_v21 = vpop.f32.mrf.mxu0 }
 0x607   : > { %v1712_v4 = vmax.f32 %v1710_v58, %v3731_v21  ;;  %v1737_v58 = vmax.f32 %v3677_v30, %v3685_v28 }
 0x608   : > { %v3733_v24 = vpop.f32.mrf.mxu0 }
 0x60a   : > { %v3735_v33 = vpop.f32.mrf.mxu0 }
 0x60b   : > { %v1713_v7 = vmax.f32 %v1711_v2, %v3735_v33  ;;  %v1740_v2 = vmax.f32 %v1738_v17, %v3697_v5 }
 0x60c   : > { %v3737_v50 = vpop.f32.mrf.mxu0 }
 0x60d   : > { %v1742_v26 = vmax.f32 %v1740_v2, %v3705_v41 }
 0x60e   : > { %v3739_v47 = vpop.f32.mrf.mxu0 }
 0x60f   : > { %4516 = vst [vmem:[#allocation18_spill] sm:$0xff] %v3739_v47  ;;  %v1714_v39 = vmax.f32 %v1712_v4, %v3739_v47  ;;  %v1739_v47 = vmax.f32 %v1737_v58, %v3693_v63  ;;  %v1744_v17 = vmax.f32 %v1742_v26, %v3713_v9 }
 0x610   : > { %v3741_v52 = vpop.f32.mrf.mxu0 }
 0x611   : > { %v1741_v28 = vmax.f32 %v1739_v47, %v3701_v35  ;;  %v1746_v2 = vmax.f32 %v1744_v17, %v3721_v13 }
 0x612   : > { %v3743_v49 = vpop.f32.mrf.mxu0 }
 0x613   : > { %4517 = vst [vmem:[#allocation19_spill] sm:$0xff] %v3743_v49  ;;  %v1715_v59 = vmax.f32 %v1713_v7, %v3743_v49  ;;  %v1743_v58 = vmax.f32 %v1741_v28, %v3709_v3  ;;  %v1748_v26 = vmax.f32 %v1746_v2, %v3729_v20 }
 0x614   : > { %v3745_v25 = vpop.f32.mrf.mxu0 }
 0x615   : > { %v1745_v47 = vmax.f32 %v1743_v58, %v3717_v11  ;;  %v1750_v17 = vmax.f32 %v1748_v26, %v3737_v50  ;;  %v3854_v26 = vpop.f32.mrf.mxu1 }
 0x616   : > { %v3747_v42 = vpop.f32.mrf.mxu0  ;;  %4522 = vst [vmem:[#allocation24_spill] sm:$0xff] %v3854_v26 }
 0x617   : > { %v1716_v60 = vmax.f32 %v1714_v39, %v3747_v42  ;;  %v1747_v28 = vmax.f32 %v1745_v47, %v3725_v18  ;;  %v1752_v58 = vmax.f32 %v1750_v17, %v3745_v25 }
 0x618   : > { %v3749_v38 = vpop.f32.mrf.mxu0 }
 0x619   : > { %v1749_v13 = vmax.f32 %v1747_v28, %v3733_v24 }
 0x61a   : > { %v3751_v43 = vpop.f32.mrf.mxu0 }
 0x61b   : > { %v1717_v16 = vmax.f32 %v1715_v59, %v3751_v43  ;;  %v1751_v2 = vmax.f32 %v1749_v13, %v3741_v52 }
 0x61c   : > { %v3753_v55 = vpop.f32.mrf.mxu0 }
 0x61d   : > { %4518 = vst [vmem:[#allocation20_spill] sm:$0xff] %v3753_v55 }
 0x61e   : > { %v3755_v53 = vpop.f32.mrf.mxu0 }
 0x61f   : > { %v1718_v4 = vmax.f32 %v1716_v60, %v3755_v53 }
 0x620   : > { %v3757_v45 = vpop.f32.mrf.mxu0 }
 0x622   : > { %v3759_v51 = vpop.f32.mrf.mxu0 }
 0x623   : > { %v1719_v7 = vmax.f32 %v1717_v16, %v3759_v51 }
 0x624   : > { %v3761_v48 = vpop.f32.mrf.mxu0 }
 0x626   : > { %v3763_v0 = vpop.f32.mrf.mxu0 }
 0x627   : > { %v1720_v39 = vmax.f32 %v1718_v4, %v3763_v0 }
 0x628   : > { %v3765_v1 = vpop.f32.mrf.mxu0 }
 0x62a   : > { %v3767_v54 = vpop.f32.mrf.mxu0 }
 0x62b   : > { %v1721_v59 = vmax.f32 %v1719_v7, %v3767_v54 }
 0x62c   : > { %v3769_v56 = vpop.f32.mrf.mxu0 }
 0x62e   : > { %v3771_v46 = vpop.f32.mrf.mxu0 }
 0x62f   : > { %v1722_v60 = vmax.f32 %v1720_v39, %v3771_v46 }
 0x630   : > { %v3777_v44 = vpop.f32.mrf.mxu0 }
 0x632   : > { %v3781_v37 = vpop.f32.mrf.mxu0 }
 0x633   : > { %v1723_v16 = vmax.f32 %v1721_v59, %v3781_v37 }
 0x634   : > { %v3785_v6 = vpop.f32.mrf.mxu0 }
 0x636   : > { %v3789_v32 = vpop.f32.mrf.mxu0 }
 0x637   : > { %v1724_v4 = vmax.f32 %v1722_v60, %v3789_v32 }
 0x638   : > { %v3793_v57 = vpop.f32.mrf.mxu0 }
 0x63a   : > { %v3797_v15 = vpop.f32.mrf.mxu0 }
 0x63b   : > { %v1725_v7 = vmax.f32 %v1723_v16, %v3797_v15 }
 0x63c   : > { %v3801_v61 = vpop.f32.mrf.mxu0 }
 0x63e   : > { %v3805_v10 = vpop.f32.mrf.mxu0 }
 0x63f   : > { %4519 = vst [vmem:[#allocation21_spill] sm:$0xff] %v3805_v10  ;;  %v1726_v39 = vmax.f32 %v1724_v4, %v3805_v10  ;;  %v1754_v4 = vmax.f32 %v1752_v58, %v3753_v55 }
 0x640   : > { %v3811_v19 = vpop.f32.mrf.mxu0 }
 0x641   : > { %4520 = vst [vmem:[#allocation22_spill] sm:$0xff] %v3811_v19  ;;  %v1756_v47 = vmax.f32 %v1754_v4, %v3761_v48 }
 0x642   : > { %v3818_v49 = vpop.f32.mrf.mxu0 }
 0x643   : > { %4521 = vst [vmem:[#allocation23_spill] sm:$0xff] %v3818_v49  ;;  %v1727_v59 = vmax.f32 %v1725_v7, %v3818_v49  ;;  %v1753_v49 = vmax.f32 %v1751_v2, %v3749_v38 }
 0x644   : > { %v3824_v22 = vpop.f32.mrf.mxu0 }
 0x646   : > { %v3830_v5 = vpop.f32.mrf.mxu0 }
 0x647   : > { %v1728_v60 = vmax.f32 %v1726_v39, %v3830_v5  ;;  %v1755_v39 = vmax.f32 %v1753_v49, %v3757_v45 }
 0x648   : > { %v3836_v41 = vpop.f32.mrf.mxu0 }
 0x649   : > { %v1757_v17 = vmax.f32 %v1755_v39, %v3765_v1 }
 0x64a   : > { %v3842_v9 = vpop.f32.mrf.mxu0 }
 0x64b   : > { %v1729_v16 = vmax.f32 %v1727_v59, %v3842_v9  ;;  %v1758_v59 = vmax.f32 %v1756_v47, %v3769_v56  ;;  %v1759_v58 = vmax.f32 %v1757_v17, %v3777_v44 }
 0x64c   : > { %v3862_v4 = vpop.f32.mrf.mxu0 }
 0x64d   : > { %v1730_v11 = vmax.f32 %v1728_v60, %v1729_v16  ;;  %v1760_v60 = vmax.f32 %v1758_v59, %v3785_v6  ;;  %v1014_v16 = vpop.f32.mrf.mxu1 }
 0x64f   : > { %v1731_v7 = vrot.slane %v1730_v11, 4  ;;  %v1762_v2 = vmax.f32 %v1760_v60, %v3801_v61  ;;  %v3866_v47 = vpop.f32.mrf.mxu1 }
 0x650   : > { %4523 = vst [vmem:[#allocation25_spill] sm:$0xff] %v3866_v47 }
 0x651   : > { %v1732_v10 = vmax.f32 %v1730_v11, %v1731_v7  ;;  %v1761_v11 = vmax.f32 %v1759_v58, %v3793_v57  ;;  %v1764_v49 = vmax.f32 %v1762_v2, %v3824_v22  ;;  %v3875_v60 = vpop.f32.mrf.mxu1 }
 0x652   : > { %4525 = vst [vmem:[#allocation27_spill] sm:$0xff] %v3875_v60 }
 0x653   : > { %v1733_v28 = vrot.slane %v1732_v10, 2  ;;  %v1763_v39 = vmax.f32 %v1761_v11, %v3811_v19  ;;  %v1766_v59 = vmax.f32 %v1764_v49, %v3862_v4  ;;  %v1024_v2 = vpop.f32.mrf.mxu1 }
 0x655   : > { %v1734_v13 = vmax.f32 %v1732_v10, %v1733_v28  ;;  %v3870_v10 = vpop.permute.xlu1 %1168  ;;  %v1765_v28 = vmax.f32 %v1763_v39, %v3836_v41  ;;  %v1165_v39 = vpop.permute.xlu0 %1164 }
 0x656   : > { %4524 = vst [vmem:[#allocation26_spill] sm:$0xff] %v3870_v10 }
 0x657   : > { %v1735_v55 = vrot.slane %v1734_v13, 1  ;;  %v1767_v26 = vmax.f32 %v1765_v28, %v1766_v59  ;;  %v3887_v59 = vadd.f32 %v1165_v39, %v1024_v2  ;;  %v1026_v28 = vpop.f32.mrf.mxu1 }
 0x658   : > { %v1192_v10 = vadd.f32 %v1165_v39, %v1026_v28  ;;  %v4531_v39 = vld [vmem:[#allocation14_spill] sm:$0xff] }
 0x659   : > { %v1736_v7 = vmax.f32 %v1734_v13, %v1735_v55  ;;  %v3881_v13 = vpop.permute.xlu1 %1172  ;;  %v1768_v49 = vrot.slane %v1767_v26, 4  ;;  %4527 = vst [vmem:[#allocation29_spill] sm:$0xff] %v3887_v59 }
 0x65a   : > { %4526 = vst [vmem:[#allocation28_spill] sm:$0xff] %v3881_v13  ;;  %2144 = vmatprep.mubr.f32.mxu1 %v1192_v10 }
 0x65b   : > { %v3873_v17 = vmax.f32 %v1736_v7, -1e+30  ;;  %v1769_v13 = vmax.f32 %v1767_v26, %v1768_v49 }
 0x65d   : > { %v1782_v58 = vsub.f32 %v3675_v36, %v3873_v17  ;;  %v1784_v55 = vsub.f32 %v3679_v23, %v3873_v17  ;;  %v1786_v11 = vsub.f32 %v3683_v31, %v3873_v17  ;;  %v1788_v7 = vsub.f32 %v3687_v29, %v3873_v17  ;;  %v3891_v19 = vpop.permute.xlu1 %1180 }
 0x65e   : > { %v1790_v36 = vsub.f32 %v3691_v62, %v3873_v17  ;;  %4528 = vst [vmem:[#allocation30_spill] sm:$0xff] %v3891_v19  ;;  %v1792_v31 = vsub.f32 %v3695_v27, %v3873_v17  ;;  %v1770_v2 = vrot.slane %v1769_v13, 2  ;;  %v1796_v62 = vsub.f32 %v3703_v40, %v3873_v17 }
 0x65f   : > { %v1846_v47 = vmul.f32 1.442695, %v1782_v58  ;;  %v1850_v60 = vmul.f32 1.442695, %v1784_v55  ;;  %v1854_v23 = vmul.f32 1.442695, %v1786_v11  ;;  %v1794_v58 = vsub.f32 %v3699_v34, %v3873_v17 }
 0x660   : > { %v1858_v29 = vmul.f32 1.442695, %v1788_v7  ;;  %v1862_v55 = vmul.f32 1.442695, %v1790_v36  ;;  %v4530_v11 = vld [vmem:[#allocation12_spill] sm:$0xff]  ;;  %v1800_v10 = vsub.f32 %v3711_v8, %v3873_v17  ;;  %v1802_v40 = vsub.f32 %v4531_v39, %v3873_v17  ;;  %v4534_v39 = vld [vmem:[#allocation19_spill] sm:$0xff] }
 0x661   : > { %2785 = vpow2.f32 %v1846_v47  ;;  %v1866_v47 = vmul.f32 1.442695, %v1792_v31  ;;  %v3899_v26 = vpop.permute.xlu1 %1156  ;;  %v1798_v49 = vsub.f32 %v4530_v11, %v3873_v17  ;;  %v1870_v27 = vmul.f32 1.442695, %v1794_v58 }
 0x662   : > { %2787 = vpow2.f32 %v1850_v60  ;;  %4529 = vst [vmem:[#allocation31_spill] sm:$0xff] %v3899_v26  ;;  %v1771_v60 = vmax.f32 %v1769_v13, %v1770_v2  ;;  %v1874_v34 = vmul.f32 1.442695, %v1796_v62  ;;  %v1188_v7 = vadd.f32 %v3899_v26, %v1014_v16  ;;  %v4532_v16 = vld [vmem:[#allocation17_spill] sm:$0xff] }
 0x663   : > { %2789 = vpow2.f32 %v1854_v23  ;;  %v1878_v28 = vmul.f32 1.442695, %v1798_v49  ;;  %v1804_v31 = vsub.f32 %v3719_v12, %v3873_v17  ;;  %v1882_v13 = vmul.f32 1.442695, %v1800_v10  ;;  %v4533_v10 = vld [vmem:[#allocation18_spill] sm:$0xff] }
 0x664   : > { %2791 = vpow2.f32 %v1858_v29  ;;  %2132 = vmatprep.mubr.f32.mxu0 %v1188_v7  ;;  %v1772_v36 = vrot.slane %v1771_v60, 1  ;;  %v1806_v8 = vsub.f32 %v3723_v14, %v3873_v17  ;;  %v1808_v58 = vsub.f32 %v4532_v16, %v3873_v17 }
 0x665   : > { %2793 = vpow2.f32 %v1862_v55  ;;  %v1886_v55 = vmul.f32 1.442695, %v1802_v40  ;;  %v1810_v12 = vsub.f32 %v3731_v21, %v3873_v17  ;;  %v1812_v11 = vsub.f32 %v3735_v33, %v3873_v17 }
 0x666   : > { %2795 = vpow2.f32 %v1866_v47  ;;  %v1773_v47 = vmax.f32 %v1771_v60, %v1772_v36  ;;  %v1890_v49 = vmul.f32 1.442695, %v1804_v31  ;;  %v1894_v7 = vmul.f32 1.442695, %v1806_v8 }
 0x667   : > { %2797 = vpow2.f32 %v1870_v27  ;;  %v1816_v40 = vsub.f32 %v4534_v39, %v3873_v17  ;;  %v1818_v33 = vsub.f32 %v3747_v42, %v3873_v17  ;;  %v1902_v36 = vmul.f32 1.442695, %v1810_v12 }
 0x668   : > { %2799 = vpow2.f32 %v1874_v34  ;;  %v1814_v34 = vsub.f32 %v4533_v10, %v3873_v17  ;;  %v3938_v31 = vmax.f32 %v1773_v47, -1e+30  ;;  %v1906_v8 = vmul.f32 1.442695, %v1812_v11  ;;  %v4535_v10 = vld [vmem:[#allocation7_spill] sm:$0xff] }
 0x669   : > { %2801 = vpow2.f32 %v1878_v28  ;;  %v1898_v28 = vmul.f32 1.442695, %v1808_v58  ;;  %v1822_v58 = vsub.f32 %v3755_v53, %v3873_v17  ;;  %v1824_v42 = vsub.f32 %v3759_v51, %v3873_v17 }
 0x66a   : > { %2803 = vpow2.f32 %v1882_v13  ;;  %v1820_v13 = vsub.f32 %v3751_v43, %v3873_v17  ;;  %v1914_v12 = vmul.f32 1.442695, %v1816_v40  ;;  %v1918_v43 = vmul.f32 1.442695, %v1818_v33 }
 0x66b   : > { %2805 = vpow2.f32 %v1886_v55  ;;  %v1910_v55 = vmul.f32 1.442695, %v1814_v34  ;;  %v1783_v11 = vsub.f32 %v3677_v30, %v3938_v31  ;;  %v1785_v34 = vsub.f32 %v4535_v10, %v3938_v31  ;;  %v4536_v30 = vld [vmem:[#allocation8_spill] sm:$0xff] }
 0x66c   : > { %2807 = vpow2.f32 %v1890_v49  ;;  %v1922_v49 = vmul.f32 1.442695, %v1820_v13  ;;  %v1826_v51 = vsub.f32 %v3763_v0, %v3873_v17  ;;  %v1926_v39 = vmul.f32 1.442695, %v1822_v58  ;;  %v4537_v0 = vld [vmem:[#allocation9_spill] sm:$0xff] }
 0x66d   : > { %2809 = vpow2.f32 %v1894_v7  ;;  %v1930_v40 = vmul.f32 1.442695, %v1824_v42  ;;  %v1848_v13 = vmul.f32 1.442695, %v1783_v11  ;;  %v1852_v58 = vmul.f32 1.442695, %v1785_v34 }
 0x66e   : > { %v3908_v23 = vpop.eup %2785  ;;  %2811 = vpow2.f32 %v1898_v28  ;;  %v1830_v42 = vsub.f32 %v3771_v46, %v3873_v17  ;;  %v4538_v46 = vld [vmem:[#allocation10_spill] sm:$0xff] }
 0x66f   : > { %v3912_v29 = vpop.eup %2787  ;;  %2813 = vpow2.f32 %v1902_v36  ;;  %v1828_v36 = vsub.f32 %v3767_v54, %v3873_v17  ;;  %v1791_v54 = vsub.f32 %v3693_v63, %v3938_v31  ;;  %v1793_v34 = vsub.f32 %v4538_v46, %v3938_v31  ;;  %v4542_v46 = vld [vmem:[#allocation13_spill] sm:$0xff] }
 0x670   : > { %v1976_v2 = vadd.f32 %v3912_v29, %v3908_v23  ;;  %v3920_v62 = vpop.eup %2789  ;;  %2815 = vpow2.f32 %v1906_v8  ;;  %v1834_v63 = vsub.f32 %v3789_v32, %v3873_v17 }
 0x671   : > { %v3927_v27 = vpop.eup %2791  ;;  %2817 = vpow2.f32 %v1910_v55 }
 0x672   : > { %v1977_v14 = vadd.f32 %v3920_v62, %v1976_v2  ;;  %v3934_v60 = vpop.eup %2793  ;;  %2819 = vpow2.f32 %v1914_v12  ;;  %v1934_v12 = vmul.f32 1.442695, %v1826_v51 }
 0x673   : > { %v3943_v2 = vpop.eup %2795  ;;  %2821 = vpow2.f32 %v1918_v43 }
 0x674   : > { %v1978_v21 = vadd.f32 %v3927_v27, %v1977_v14  ;;  %v3950_v14 = vpop.eup %2797  ;;  %2823 = vpow2.f32 %v1922_v49  ;;  %v1832_v49 = vsub.f32 %v3781_v37, %v3873_v17 }
 0x675   : > { %v3957_v7 = vpop.eup %2799  ;;  %2825 = vpow2.f32 %v1926_v39 }
 0x676   : > { %v1979_v16 = vadd.f32 %v3934_v60, %v1978_v21  ;;  %v1787_v21 = vsub.f32 %v4536_v30, %v3938_v31  ;;  %v3964_v33 = vpop.eup %2801  ;;  %2827 = vpow2.f32 %v1930_v40  ;;  %v1942_v40 = vmul.f32 1.442695, %v1830_v42 }
 0x677   : > { %v3971_v55 = vpop.eup %2803  ;;  %2829 = vpow2.f32 %v1848_v13  ;;  %v1795_v30 = vsub.f32 %v3701_v35, %v3938_v31  ;;  %v1836_v13 = vsub.f32 %v3797_v15, %v3873_v17  ;;  %v1868_v42 = vmul.f32 1.442695, %v1793_v34 }
 0x678   : > { %v1980_v47 = vadd.f32 %v3943_v2, %v1979_v16  ;;  %v1789_v16 = vsub.f32 %v4537_v0, %v3938_v31  ;;  %v1856_v43 = vmul.f32 1.442695, %v1787_v21  ;;  %v3978_v11 = vpop.eup %2805  ;;  %2831 = vpow2.f32 %v1852_v58 }
 0x679   : > { %v3985_v39 = vpop.eup %2807  ;;  %2833 = vpow2.f32 %v1934_v12  ;;  %v1864_v21 = vmul.f32 1.442695, %v1791_v54  ;;  %v1950_v35 = vmul.f32 1.442695, %v1834_v63  ;;  %v1801_v34 = vsub.f32 %v4542_v46, %v3938_v31 }
 0x67a   : > { %v1981_v53 = vadd.f32 %v3950_v14, %v1980_v47  ;;  %v1860_v51 = vmul.f32 1.442695, %v1789_v16  ;;  %2835 = vpow2.f32 %v1856_v43  ;;  %v4539_v16 = vld [vmem:[#allocation11_spill] sm:$0xff]  ;;  %v1813_v43 = vsub.f32 %v3737_v50, %v3938_v31 }
 0x67b   : > { %v1797_v58 = vsub.f32 %v4539_v16, %v3938_v31  ;;  %v1811_v63 = vsub.f32 %v3733_v24, %v3938_v31  ;;  %v4544_v50 = vld [vmem:[#allocation15_spill] sm:$0xff]  ;;  %v4545_v24 = vld [vmem:[#allocation16_spill] sm:$0xff]  ;;  %v1807_v46 = vsub.f32 %v3725_v18, %v3938_v31 }
 0x67c   : > { %v1982_v28 = vadd.f32 %v3957_v7, %v1981_v53  ;;  %v1938_v53 = vmul.f32 1.442695, %v1828_v36  ;;  %v1908_v16 = vmul.f32 1.442695, %v1813_v43  ;;  %v4547_v18 = vld [vmem:[#allocation23_spill] sm:$0xff] }
 0x67e   : > { %v1983_v8 = vadd.f32 %v3964_v33, %v1982_v28  ;;  %v3989_v28 = vpop.eup %2809  ;;  %2837 = vpow2.f32 %v1938_v53 }
 0x67f   : > { %v3994_v36 = vpop.eup %2811  ;;  %2839 = vpow2.f32 %v1860_v51 }
 0x680   : > { %v1984_v47 = vadd.f32 %v3971_v55, %v1983_v8  ;;  %v1946_v8 = vmul.f32 1.442695, %v1832_v49  ;;  %v3998_v0 = vpop.eup %2813  ;;  %2841 = vpow2.f32 %v1942_v40  ;;  %v1872_v49 = vmul.f32 1.442695, %v1795_v30 }
 0x681   : > { %v4003_v12 = vpop.eup %2815  ;;  %2843 = vpow2.f32 %v1864_v21  ;;  %v1876_v40 = vmul.f32 1.442695, %v1797_v58  ;;  %v1803_v30 = vsub.f32 %v4544_v50, %v3938_v31  ;;  %v1805_v58 = vsub.f32 %v4545_v24, %v3938_v31 }
 0x682   : > { %v1985_v10 = vadd.f32 %v3978_v11, %v1984_v47  ;;  %v1799_v47 = vsub.f32 %v3709_v3, %v3938_v31  ;;  %v4007_v54 = vpop.eup %2817  ;;  %2845 = vpow2.f32 %v1946_v8 }
 0x683   : > { %4540 = vst [vmem:[#allocation12_spill] sm:$0xff] %v4007_v54  ;;  %v4012_v53 = vpop.eup %2819  ;;  %2847 = vpow2.f32 %v1868_v42  ;;  %v1884_v42 = vmul.f32 1.442695, %v1801_v34 }
 0x684   : > { %v1986_v37 = vadd.f32 %v3985_v39, %v1985_v10  ;;  %4541 = vst [vmem:[#allocation14_spill] sm:$0xff] %v4012_v53  ;;  %v1954_v10 = vmul.f32 1.442695, %v1836_v13  ;;  %v4016_v51 = vpop.eup %2821  ;;  %2849 = vpow2.f32 %v1950_v35  ;;  %v1880_v21 = vmul.f32 1.442695, %v1799_v47 }
 0x685   : > { %4543 = vst [vmem:[#allocation17_spill] sm:$0xff] %v4016_v51  ;;  %2851 = vpow2.f32 %v1872_v49  ;;  %v1888_v49 = vmul.f32 1.442695, %v1803_v30 }
 0x686   : > { %v1987_v32 = vadd.f32 %v3989_v28, %v1986_v37  ;;  %v4021_v37 = vpop.eup %2823  ;;  %2853 = vpow2.f32 %v1954_v10 }
 0x687   : > { %v4025_v13 = vpop.eup %2825  ;;  %2855 = vpow2.f32 %v1876_v40  ;;  %v1892_v40 = vmul.f32 1.442695, %v1805_v58 }
 0x688   : > { %v1988_v15 = vadd.f32 %v3994_v36, %v1987_v32  ;;  %v1809_v32 = vsub.f32 %v3729_v20, %v3938_v31  ;;  %v4546_v20 = vld [vmem:[#allocation21_spill] sm:$0xff]  ;;  %2857 = vpow2.f32 %v1880_v21  ;;  %v1896_v21 = vmul.f32 1.442695, %v1807_v46 }
 0x689   : > { %v1838_v43 = vsub.f32 %v4546_v20, %v3873_v17  ;;  %v1844_v46 = vsub.f32 %v3842_v9, %v3873_v17  ;;  %v1815_v9 = vsub.f32 %v3741_v52, %v3938_v31  ;;  %v1819_v52 = vsub.f32 %v3749_v38, %v3938_v31 }
 0x68a   : > { %v1989_v3 = vadd.f32 %v3998_v0, %v1988_v15  ;;  %v4030_v15 = vpop.eup %2827  ;;  %v1900_v24 = vmul.f32 1.442695, %v1809_v32  ;;  %2859 = vpow2.f32 %v1908_v16  ;;  %v1842_v16 = vsub.f32 %v3830_v5, %v3873_v17 }
 0x68b   : > { %v4034_v35 = vpop.eup %2829  ;;  %2861 = vpow2.f32 %v1884_v42 }
 0x68c   : > { %v1990_v8 = vadd.f32 %v4003_v12, %v1989_v3  ;;  %v1904_v3 = vmul.f32 1.442695, %v1811_v63  ;;  %v4039_v50 = vpop.eup %2831  ;;  %v1840_v63 = vsub.f32 %v4547_v18, %v3873_v17 }
 0x68d   : > { %v4043_v10 = vpop.eup %2833 }
 0x68e   : > { %v1991_v47 = vadd.f32 %v4007_v54, %v1990_v8  ;;  %v2013_v8 = vadd.f32 %v4039_v50, %v4034_v35  ;;  %v4048_v19 = vpop.eup %2835  ;;  %2863 = vpow2.f32 %v1904_v3  ;;  %v1958_v54 = vmul.f32 1.442695, %v1838_v43 }
 0x68f   : > { %v4052_v59 = vpop.eup %2837  ;;  %2865 = vpow2.f32 %v1888_v49 }
 0x690   : > { %v1992_v34 = vadd.f32 %v4012_v53, %v1991_v47  ;;  %v2014_v47 = vadd.f32 %v4048_v19, %v2013_v8  ;;  %v4056_v32 = vpop.eup %2839  ;;  %2867 = vpow2.f32 %v1900_v24  ;;  %v1966_v8 = vmul.f32 1.442695, %v1842_v16 }
 0x691   : > { %v4060_v20 = vpop.eup %2841  ;;  %2869 = vpow2.f32 %v1892_v40  ;;  %v1817_v16 = vsub.f32 %v3745_v25, %v3938_v31 }
 0x692   : > { %v1993_v30 = vadd.f32 %v4016_v51, %v1992_v34  ;;  %v2015_v58 = vadd.f32 %v4056_v32, %v2014_v47  ;;  %v4064_v18 = vpop.eup %2843  ;;  %v1962_v34 = vmul.f32 1.442695, %v1840_v63  ;;  %2871 = vpow2.f32 %v1896_v21 }
 0x693   : > { %v4068_v3 = vpop.eup %2845  ;;  %2873 = vpow2.f32 %v1958_v54  ;;  %v1970_v63 = vmul.f32 1.442695, %v1844_v46  ;;  %v1916_v51 = vmul.f32 1.442695, %v1817_v16 }
 0x694   : > { %v1994_v42 = vadd.f32 %v4021_v37, %v1993_v30  ;;  %v2016_v49 = vadd.f32 %v4064_v18, %v2015_v58  ;;  %v4072_v43 = vpop.eup %2847  ;;  %2875 = vpow2.f32 %v1962_v34 }
 0x695   : > { %v4074_v24 = vpop.eup %2849  ;;  %2877 = vpow2.f32 %v1966_v8 }
 0x696   : > { %v1995_v5 = vadd.f32 %v4025_v13, %v1994_v42  ;;  %v2017_v40 = vadd.f32 %v4072_v43, %v2016_v49  ;;  %v4080_v47 = vpop.eup %2851  ;;  %v1912_v49 = vmul.f32 1.442695, %v1815_v9  ;;  %2879 = vpow2.f32 %v1970_v63 }
 0x697   : > { %v4082_v42 = vpop.eup %2853  ;;  %v1823_v9 = vsub.f32 %v3757_v45, %v3938_v31  ;;  %v1825_v45 = vsub.f32 %v3761_v48, %v3938_v31 }
 0x698   : > { %v1996_v30 = vadd.f32 %v4030_v15, %v1995_v5  ;;  %v2018_v54 = vadd.f32 %v4080_v47, %v2017_v40  ;;  %v4088_v58 = vpop.eup %2855  ;;  %2881 = vpow2.f32 %v1912_v49 }
 0x699   : > { %v4092_v5 = vpop.eup %2857  ;;  %2883 = vpow2.f32 %v1916_v51 }
 0x69a   : > { %v1997_v21 = vadd.f32 %v4043_v10, %v1996_v30  ;;  %v2019_v34 = vadd.f32 %v4088_v58, %v2018_v54  ;;  %v4096_v26 = vpop.eup %2859  ;;  %v4548_v30 = vld [vmem:[#allocation20_spill] sm:$0xff] }
 0x69b   : > { %v1821_v25 = vsub.f32 %v4548_v30, %v3938_v31  ;;  %v4100_v53 = vpop.eup %2861  ;;  %2068 = vmatprep.subr.mxu0 %v4096_v26  ;;  %2646 = vmatprep.subr.mxu1 %v4096_v26 }
 0x69c   : > { %v1998_v46 = vadd.f32 %v4052_v59, %v1997_v21  ;;  %v2020_v38 = vadd.f32 %v4092_v5, %v2019_v34  ;;  %v4106_v8 = vpop.eup %2863  ;;  %v1920_v21 = vmul.f32 1.442695, %v1819_v52  ;;  %2069 = vmatpush1.msra.mxu0 %v4003_v12  ;;  %2678 = vmatpush1.msra.mxu1 %v4003_v12 }
 0x69d   : > { %v2866_v63 = vpop.eup %2865  ;;  %2070 = vmatprep.subr.mxu0 %v4106_v8  ;;  %2647 = vmatprep.subr.mxu1 %v4106_v8  ;;  %v1924_v49 = vmul.f32 1.442695, %v1821_v25 }
 0x69e   : > { %v1999_v40 = vadd.f32 %v4060_v20, %v1998_v46  ;;  %v2021_v16 = vadd.f32 %v4100_v53, %v2020_v38  ;;  %v1776_v46 = vsub.f32 -1e+30, %v3873_v17  ;;  %v2868_v34 = vpop.eup %2867  ;;  %2071 = vmatpush1.msra.mxu0 %v3998_v0  ;;  %2679 = vmatpush1.msra.mxu1 %v3998_v0  ;;  %v1827_v17 = vsub.f32 %v3765_v1, %v3938_v31 }
 0x69f   : > { %v2870_v12 = vpop.eup %2869  ;;  %2072 = vmatprep.subr.mxu0 %v2868_v34  ;;  %2648 = vmatprep.subr.mxu1 %v2868_v34  ;;  %v1928_v38 = vmul.f32 1.442695, %v1823_v9  ;;  %2885 = vpow2.f32 %v1920_v21 }
 0x6a0   : > { %v2000_v54 = vadd.f32 %v4068_v3, %v1999_v40  ;;  %v2022_v30 = vadd.f32 %v2866_v63, %v2021_v16  ;;  %v2872_v40 = vpop.eup %2871  ;;  %2073 = vmatpush1.msra.mxu0 %v3994_v36  ;;  %2680 = vmatpush1.msra.mxu1 %v3994_v36  ;;  %v1778_v51 = vmul.f32 1.442695, %v1776_v46  ;;  %2887 = vpow2.f32 %v1924_v49 }
 0x6a1   : > { %2074 = vmatprep.subr.mxu0 %v2872_v40  ;;  %2649 = vmatprep.subr.mxu1 %v2872_v40  ;;  %v4127_v25 = vpop.eup %2873  ;;  %v1932_v36 = vmul.f32 1.442695, %v1825_v45  ;;  %v1831_v16 = vsub.f32 %v3777_v44, %v3938_v31  ;;  %v1845_v46 = vsub.f32 %v3862_v4, %v3938_v31  ;;  %2889 = vpow2.f32 %v1928_v38 }
 0x6a2   : > { %v2001_v52 = vadd.f32 %v4074_v24, %v2000_v54  ;;  %v2023_v0 = vadd.f32 %v2870_v12, %v2022_v30  ;;  %v1829_v54 = vsub.f32 %v3769_v56, %v3938_v31  ;;  %2075 = vmatpush1.msra.mxu0 %v3989_v28  ;;  %2681 = vmatpush1.msra.mxu1 %v3989_v28  ;;  %v4134_v21 = vpop.eup %2875  ;;  %v1936_v28 = vmul.f32 1.442695, %v1827_v17 }
 0x6a3   : > { %2076 = vmatprep.subr.mxu0 %v2870_v12  ;;  %2650 = vmatprep.subr.mxu1 %v2870_v12  ;;  %2891 = vpow2.f32 %v1778_v51  ;;  %v4143_v12 = vpop.eup %2877  ;;  %v1833_v44 = vsub.f32 %v3785_v6, %v3938_v31  ;;  %v1843_v4 = vsub.f32 %v3836_v41, %v3938_v31  ;;  %v1835_v6 = vsub.f32 %v3793_v57, %v3938_v31  ;;  %v4549_v57 = vld [vmem:[#allocation22_spill] sm:$0xff] }
 0x6a4   : > { %v2002_v48 = vadd.f32 %v4082_v42, %v2001_v52  ;;  %v2024_v9 = vadd.f32 %v2872_v40, %v2023_v0  ;;  %2077 = vmatpush1.msra.mxu0 %v3985_v39  ;;  %2682 = vmatpush1.msra.mxu1 %v3985_v39  ;;  %2893 = vpow2.f32 %v1932_v36  ;;  %v1940_v52 = vmul.f32 1.442695, %v1829_v54 }
 0x6a5   : > { %2078 = vmatprep.subr.mxu0 %v2866_v63  ;;  %2651 = vmatprep.subr.mxu1 %v2866_v63  ;;  %v4155_v63 = vpop.eup %2879  ;;  %v1841_v41 = vsub.f32 %v3824_v22, %v3938_v31  ;;  %v1944_v49 = vmul.f32 1.442695, %v1831_v16  ;;  %2895 = vpow2.f32 %v1936_v28  ;;  %v1837_v22 = vsub.f32 %v3801_v61, %v3938_v31 }
 0x6a6   : > { %v2003_v1 = vadd.f32 %v4127_v25, %v2002_v48  ;;  %v2025_v45 = vadd.f32 %v2868_v34, %v2024_v9  ;;  %2079 = vmatpush1.msra.mxu0 %v3978_v11  ;;  %2683 = vmatpush1.msra.mxu1 %v3978_v11  ;;  %v1839_v40 = vsub.f32 %v4549_v57, %v3938_v31  ;;  %v1948_v17 = vmul.f32 1.442695, %v1833_v44 }
 0x6a7   : > { %2080 = vmatprep.subr.mxu0 %v4100_v53  ;;  %2652 = vmatprep.subr.mxu1 %v4100_v53  ;;  %v4167_v53 = vpop.eup %2881  ;;  %2897 = vpow2.f32 %v1940_v52  ;;  %v1952_v61 = vmul.f32 1.442695, %v1835_v6  ;;  %v1964_v0 = vmul.f32 1.442695, %v1841_v41 }
 0x6a8   : > { %v2004_v56 = vadd.f32 %v4134_v21, %v2003_v1  ;;  %v2026_v34 = vadd.f32 %v4106_v8, %v2025_v45  ;;  %2081 = vmatpush1.msra.mxu0 %v3971_v55  ;;  %2684 = vmatpush1.msra.mxu1 %v3971_v55  ;;  %v1972_v8 = vmul.f32 1.442695, %v1845_v46  ;;  %2899 = vpow2.f32 %v1944_v49 }
 0x6a9   : > { %2082 = vmatprep.subr.mxu0 %v4092_v5  ;;  %2653 = vmatprep.subr.mxu1 %v4092_v5  ;;  %v4178_v5 = vpop.eup %2883  ;;  %v1960_v1 = vmul.f32 1.442695, %v1839_v40 }
 0x6aa   : > { %v2005_v39 = vadd.f32 %v4143_v12, %v2004_v56  ;;  %v2027_v30 = vadd.f32 %v4096_v26, %v2026_v34  ;;  %2083 = vmatpush1.msra.mxu0 %v3964_v33  ;;  %2685 = vmatpush1.msra.mxu1 %v3964_v33  ;;  %v1968_v26 = vmul.f32 1.442695, %v1843_v4  ;;  %2901 = vpow2.f32 %v1972_v8 }
 0x6ab   : > { %2084 = vmatprep.subr.mxu0 %v4088_v58  ;;  %2654 = vmatprep.subr.mxu1 %v4088_v58  ;;  %2903 = vpow2.f32 %v1948_v17  ;;  %v1956_v58 = vmul.f32 1.442695, %v1837_v22 }
 0x6ac   : > { %v2006_v11 = vadd.f32 %v4155_v63, %v2005_v39  ;;  %v2028_v38 = vadd.f32 %v4167_v53, %v2027_v30  ;;  %2085 = vmatpush1.msra.mxu0 %v3957_v7  ;;  %2686 = vmatpush1.msra.mxu1 %v3957_v7  ;;  %v4185_v51 = vpop.eup %2885  ;;  %2905 = vpow2.f32 %v1968_v26  ;;  %v4250_v30 = vpop.permute.xlu0 %1176  ;;  %v4550_v26 = vld [vmem:[#allocation17_spill] sm:$0xff] }
 0x6ad   : > { %2086 = vmatprep.subr.mxu0 %v4080_v47  ;;  %2655 = vmatprep.subr.mxu1 %v4080_v47  ;;  %v4192_v36 = vpop.eup %2887  ;;  %2907 = vpow2.f32 %v1952_v61 }
 0x6ae   : > { %v2007_v55 = vrot.slane %v2006_v11, 4  ;;  %v2029_v33 = vadd.f32 %v4178_v5, %v2028_v38  ;;  %2087 = vmatpush1.msra.mxu0 %v3950_v14  ;;  %2687 = vmatpush1.msra.mxu1 %v3950_v14  ;;  %v4196_v47 = vpop.eup %2889  ;;  %2909 = vpow2.f32 %v1964_v0 }
 0x6af   : > { %2088 = vmatprep.subr.mxu0 %v4072_v43  ;;  %2656 = vmatprep.subr.mxu1 %v4072_v43  ;;  %2911 = vpow2.f32 %v1956_v58 }
 0x6b0   : > { %v2008_v48 = vadd.f32 %v2007_v55, %v2006_v11  ;;  %v2030_v7 = vadd.f32 %v4185_v51, %v2029_v33  ;;  %2089 = vmatpush1.msra.mxu0 %v3943_v2  ;;  %2688 = vmatpush1.msra.mxu1 %v3943_v2  ;;  %v2892_v16 = vpop.eup %2891  ;;  %2913 = vpow2.f32 %v1960_v1  ;;  %v1185_v57 = vpop.permute.xlu0 %1184  ;;  %v4553_v33 = vld [vmem:[#allocation24_spill] sm:$0xff] }
 0x6b1   : > { %2090 = vmatprep.subr.mxu0 %v4064_v18  ;;  %2657 = vmatprep.subr.mxu1 %v4064_v18  ;;  %v4206_v46 = vpop.eup %2893 }
 0x6b2   : > { %v2009_v54 = vrot.slane %v2008_v48, 2  ;;  %v2031_v14 = vadd.f32 %v4192_v36, %v2030_v7  ;;  %2091 = vmatpush1.msra.mxu0 %v3934_v60  ;;  %2689 = vmatpush1.msra.mxu1 %v3934_v60  ;;  %v4213_v60 = vmul.f32 0.0, %v2892_v16  ;;  %v4215_v28 = vpop.eup %2895  ;;  %v4557_v7 = vld [vmem:[#allocation29_spill] sm:$0xff]  ;;  %v4559_v16 = vld [vmem:[#allocation28_spill] sm:$0xff] }
 0x6b3   : > { %2092 = vmatprep.subr.mxu0 %v4056_v32  ;;  %2658 = vmatprep.subr.mxu1 %v4056_v32 }
 0x6b4   : > { %v2010_v9 = vadd.f32 %v2009_v54, %v2008_v48  ;;  %v2032_v2 = vadd.f32 %v4196_v47, %v2031_v14  ;;  %2093 = vmatpush1.msra.mxu0 %v3927_v27  ;;  %2690 = vmatpush1.msra.mxu1 %v3927_v27  ;;  %v2898_v45 = vpop.eup %2897  ;;  %v4552_v48 = vld [vmem:[#allocation26_spill] sm:$0xff]  ;;  %v4555_v54 = vld [vmem:[#allocation12_spill] sm:$0xff] }
 0x6b5   : > { %2094 = vmatprep.subr.mxu0 %v4048_v19  ;;  %2659 = vmatprep.subr.mxu1 %v4048_v19  ;;  %v2900_v19 = vpop.eup %2899 }
 0x6b6   : > { %v2011_v43 = vrot.slane %v2010_v9, 1  ;;  %v2033_v56 = vadd.f32 %v4206_v46, %v2032_v2  ;;  %2095 = vmatpush1.msra.mxu0 %v3920_v62  ;;  %2691 = vmatpush1.msra.mxu1 %v3920_v62 }
 0x6b7   : > { %2096 = vmatprep.subr.mxu0 %v4039_v50  ;;  %2660 = vmatprep.subr.mxu1 %v4039_v50  ;;  %v2902_v62 = vpop.eup %2901 }
 0x6b8   : > { %v2012_v18 = vadd.f32 %v2011_v43, %v2010_v9  ;;  %v2034_v32 = vadd.f32 %v4215_v28, %v2033_v56  ;;  %2097 = vmatpush1.msra.mxu0 %v3912_v29  ;;  %2692 = vmatpush1.msra.mxu1 %v3912_v29  ;;  %v2904_v50 = vpop.eup %2903  ;;  %v4558_v9 = vld [vmem:[#allocation25_spill] sm:$0xff] }
 0x6b9   : > { %2098 = vmatprep.subr.mxu0 %v4034_v35  ;;  %2661 = vmatprep.subr.mxu1 %v4034_v35  ;;  %v2906_v39 = vpop.eup %2905  ;;  %v1777_v35 = vsub.f32 -1e+30, %v3938_v31 }
 0x6ba   : > { %v4223_v27 = vadd.f32 %v2012_v18, %v4213_v60  ;;  %v2035_v44 = vadd.f32 %v2898_v45, %v2034_v32  ;;  %2099 = vmatpush1.msra.mxu0 %v3908_v23  ;;  %2693 = vmatpush1.msra.mxu1 %v3908_v23  ;;  %v2908_v29 = vpop.eup %2907 }
 0x6bb   : > { %2100 = vmatprep.subr.mxu0 %v2902_v62  ;;  %2662 = vmatprep.subr.mxu1 %v2902_v62  ;;  %v2910_v34 = vpop.eup %2909  ;;  %v1780_v49 = vmul.f32 1.442695, %v1777_v35  ;;  %v2227_v35 = vld [vmem:[%s4469_s1 + $0x20] sm:$0xff] }
 0x6bc   : > { %v2036_v4 = vadd.f32 %v2900_v19, %v2035_v44  ;;  %2101 = vmatpush2.msra.mxu0 %v4155_v63  ;;  %2694 = vmatpush2.msra.mxu1 %v4155_v63  ;;  %v2912_v23 = vpop.eup %2911 }
 0x6bd   : > { %2102 = vmatprep.subr.mxu0 %v2906_v39  ;;  %2663 = vmatprep.subr.mxu1 %v2906_v39  ;;  %v2914_v41 = vpop.eup %2913  ;;  %2915 = vpow2.f32 %v1780_v49 }
 0x6be   : > { %v2037_v52 = vadd.f32 %v2904_v50, %v2036_v4  ;;  %2103 = vmatpush2.msra.mxu0 %v4143_v12  ;;  %2695 = vmatpush2.msra.mxu1 %v4143_v12  ;;  %v4240_v12 = vpop.f32.mrf.mxu1  ;;  %v2223_v4 = vld [vmem:[%s4469_s1] sm:$0xff]  ;;  %2917 = vrcp.f32 %v4223_v27 }
 0x6bf   : > { %2104 = vmatprep.subr.mxu0 %v2910_v34  ;;  %2664 = vmatprep.subr.mxu1 %v2910_v34 }
 0x6c0   : > { %v2038_v6 = vadd.f32 %v2908_v29, %v2037_v52  ;;  %2105 = vmatpush2.msra.mxu0 %v4134_v21  ;;  %2696 = vmatpush2.msra.mxu1 %v4134_v21  ;;  %v2225_v52 = vld [vmem:[%s4469_s1 + $0x10] sm:$0xff] }
 0x6c1   : > { %2106 = vmatprep.subr.mxu0 %v2914_v41  ;;  %2665 = vmatprep.subr.mxu1 %v2914_v41 }
 0x6c2   : > { %v2039_v63 = vadd.f32 %v2912_v23, %v2038_v6  ;;  %2107 = vmatpush2.msra.mxu0 %v4127_v25  ;;  %2697 = vmatpush2.msra.mxu1 %v4127_v25  ;;  %v1032_v25 = vpop.f32.mrf.mxu1  ;;  %v2228_v6 = vld [vmem:[%s4469_s1 + $0x28] sm:$0xff] }
 0x6c3   : > { %2108 = vmatprep.subr.mxu0 %v2912_v23  ;;  %2666 = vmatprep.subr.mxu1 %v2912_v23  ;;  %v1194_v0 = vadd.f32 %v4552_v48, %v1032_v25  ;;  %v2229_v23 = vld [vmem:[%s4469_s1 + $0x30] sm:$0xff] }
 0x6c4   : > { %v2040_v31 = vadd.f32 %v2914_v41, %v2039_v63  ;;  %2109 = vmatpush2.msra.mxu0 %v4082_v42  ;;  %2698 = vmatpush2.msra.mxu1 %v4082_v42  ;;  %v2230_v41 = vld [vmem:[%s4469_s1 + $0x38] sm:$0xff] }
 0x6c5   : > { %2110 = vmatprep.subr.mxu0 %v2908_v29  ;;  %2667 = vmatprep.subr.mxu1 %v2908_v29  ;;  %v3014_v29 = vmov 5  }
 0x6c6   : > { %v2041_v11 = vadd.f32 %v2910_v34, %v2040_v31  ;;  %2111 = vmatpush2.msra.mxu0 %v4074_v24  ;;  %2699 = vmatpush2.msra.mxu1 %v4074_v24  ;;  %v1036_v24 = vpop.f32.mrf.mxu1  ;;  %v2226_v34 = vld [vmem:[%s4469_s1 + $0x18] sm:$0xff] }
 0x6c7   : > { %2112 = vmatprep.subr.mxu0 %v2904_v50  ;;  %2668 = vmatprep.subr.mxu1 %v2904_v50  ;;  %v1195_v2 = vadd.f32 %v4559_v16, %v1036_v24  ;;  %v4561_v50 = vmov 0.0  }
 0x6c8   : > { %v2042_v21 = vadd.f32 %v2906_v39, %v2041_v11  ;;  %2113 = vmatpush2.msra.mxu0 %v4068_v3  ;;  %2700 = vmatpush2.msra.mxu1 %v4068_v3  ;;  %v1038_v3 = vpop.f32.mrf.mxu1  ;;  %v2224_v39 = vld [vmem:[%s4469_s1 + $0x8] sm:$0xff] }
 0x6c9   : > { %2114 = vmatprep.subr.mxu0 %v2900_v19  ;;  %2669 = vmatprep.subr.mxu1 %v2900_v19  ;;  %v1196_v43 = vadd.f32 %v4559_v16, %v1038_v3 }
 0x6ca   : > { %v2043_v8 = vadd.f32 %v2902_v62, %v2042_v21  ;;  %2115 = vmatpush2.msra.mxu0 %v4060_v20  ;;  %2701 = vmatpush2.msra.mxu1 %v4060_v20  ;;  %v2916_v40 = vpop.eup %2915  ;;  %v1042_v17 = vpop.f32.mrf.mxu1 }
 0x6cb   : > { %2116 = vmatprep.subr.mxu0 %v2898_v45  ;;  %2670 = vmatprep.subr.mxu1 %v2898_v45  ;;  %v4272_v55 = vmul.f32 0.0, %v2916_v40  ;;  %v1197_v56 = vadd.f32 %v4250_v30, %v1042_v17  ;;  %v2918_v11 = vpop.eup %2917 }
 0x6cc   : > { %v2044_v42 = vrot.slane %v2043_v8, 4  ;;  %2117 = vmatpush2.msra.mxu0 %v4052_v59  ;;  %2702 = vmatpush2.msra.mxu1 %v4052_v59  ;;  %v1044_v38 = vpop.f32.mrf.mxu1 }
 0x6cd   : > { %2118 = vmatprep.subr.mxu0 %v4215_v28  ;;  %2671 = vmatprep.subr.mxu1 %v4215_v28  ;;  %v4560_v28 = vld [vmem:[#allocation30_spill] sm:$0xff] }
 0x6ce   : > { %v2045_v22 = vadd.f32 %v2044_v42, %v2043_v8  ;;  %2119 = vmatpush2.msra.mxu0 %v4043_v10  ;;  %2703 = vmatpush2.msra.mxu1 %v4043_v10 }
 0x6cf   : > { %2120 = vmatprep.subr.mxu0 %v4206_v46  ;;  %2672 = vmatprep.subr.mxu1 %v4206_v46  ;;  %v1198_v46 = vadd.f32 %v4250_v30, %v1044_v38 }
 0x6d0   : > { %v2046_v20 = vrot.slane %v2045_v22, 2  ;;  %2121 = vmatpush2.msra.mxu0 %v4030_v15  ;;  %2704 = vmatpush2.msra.mxu1 %v4030_v15 }
 0x6d1   : > { %2122 = vmatprep.subr.mxu0 %v4196_v47  ;;  %2673 = vmatprep.subr.mxu1 %v4196_v47  ;;  %v1193_v47 = vadd.f32 %v4552_v48, %v4240_v12 }
 0x6d2   : > { %v2047_v59 = vadd.f32 %v2046_v20, %v2045_v22  ;;  %2123 = vmatpush2.msra.mxu0 %v4025_v13  ;;  %2705 = vmatpush2.msra.mxu1 %v4025_v13  ;;  %v1161_v13 = vpop.permute.xlu0 %1160 }
 0x6d3   : > { %2124 = vmatprep.subr.mxu0 %v4192_v36  ;;  %2674 = vmatprep.subr.mxu1 %v4192_v36  ;;  %v1048_v36 = vpop.f32.mrf.mxu1  ;;  %v1189_v14 = vadd.f32 %v1161_v13, %v4558_v9 }
 0x6d4   : > { %v2048_v10 = vrot.slane %v2047_v59, 1  ;;  %2125 = vmatpush2.msra.mxu0 %v4021_v37  ;;  %2706 = vmatpush2.msra.mxu1 %v4021_v37  ;;  %v4551_v37 = vld [vmem:[#allocation14_spill] sm:$0xff]  ;;  %v1199_v19 = vadd.f32 %v4560_v28, %v1048_v36 }
 0x6d5   : > { %2126 = vmatprep.subr.mxu0 %v4185_v51  ;;  %2675 = vmatprep.subr.mxu1 %v4185_v51  ;;  %v4554_v51 = vld [vmem:[#allocation31_spill] sm:$0xff] }
 0x6d6   : > { %v2049_v15 = vadd.f32 %v2048_v10, %v2047_v59  ;;  %2127 = vmatpush2.msra.mxu0 %v4550_v26  ;;  %2707 = vmatpush2.msra.mxu1 %v4550_v26  ;;  %v1187_v58 = vadd.f32 %v4554_v51, %v4553_v33 }
 0x6d7   : > { %2128 = vmatprep.subr.mxu0 %v4178_v5  ;;  %2676 = vmatprep.subr.mxu1 %v4178_v5  ;;  %v4556_v5 = vld [vmem:[#allocation27_spill] sm:$0xff] }
 0x6d8   : > { %v2051_v61 = vadd.f32 %v2049_v15, %v4272_v55  ;;  %2129 = vmatpush2.msra.mxu0 %v4551_v37  ;;  %2708 = vmatpush2.msra.mxu1 %v4551_v37  ;;  %v1190_v1 = vadd.f32 %v1161_v13, %v4556_v5 }
 0x6d9   : > { %2130 = vmatprep.subr.mxu0 %v4167_v53  ;;  %2677 = vmatprep.subr.mxu1 %v4167_v53  ;;  %v1050_v53 = vpop.f32.mrf.mxu1 }
 0x6da   : > { %2131 = vmatpush2.msra.mxu0 %v4555_v54  ;;  %2709 = vmatpush2.msra.mxu1 %v4555_v54  ;;  %v1200_v32 = vadd.f32 %v4560_v28, %v1050_v53  ;;  %2919 = vrcp.f32 %v2051_v61 }
 0x6db   : > { %2133 = vmatmul.mubr.f32.vlgmr.msra.gmra.mxu0 %v1187_v58  ;;  %2145 = vmatmul.mubr.f32.vlgmr.msra.gmra.mxu1 %v4557_v7  ;;  %v1054_v18 = vpop.f32.mrf.mxu1 }
 0x6dc   : > { %2138 = vmatprep.mubr.f32.mxu0 %v1190_v1  ;;  %2150 = vmatprep.mubr.f32.mxu1 %v1194_v0  ;;  %v1201_v62 = vadd.f32 %v1185_v57, %v1054_v18 }
 0x6dd   : > { %v1056_v45 = vpop.f32.mrf.mxu1  ;;  %2767 = vset.pattern.permute.xlu1 %v3014_v29  ;;  %2768 = vset.pattern.permute.xlu0 %v3014_v29  ;;  %v2221_v29 = vld [vmem:[%s4472_s4 + $0x30] sm:$0xff] }
 0x6de   : > { %v1202_v44 = vadd.f32 %v1185_v57, %v1056_v45  ;;  %2233 = vperm.xlu1 %2767, %v2223_v4   ;;  %2238 = vperm.xlu0 %2768, %v2224_v39   ;;  %v2219_v4 = vld [vmem:[%s4472_s4 + $0x20] sm:$0xff]  ;;  %v2220_v39 = vld [vmem:[%s4472_s4 + $0x28] sm:$0xff] }
 0x6df   : > { %2139 = vmatmul.mubr.f32.gmra.mxu0 %v1189_v14  ;;  %2151 = vmatmul.mubr.f32.gmra.mxu1 %v1193_v47 }
 0x6e0   : > { %2156 = vmatprep.mubr.f32.mxu1 %v1196_v43 }
 0x6e2   : > { %2243 = vperm.xlu1 %2767, %v2225_v52   ;;  %2253 = vperm.xlu0 %2768, %v2227_v35   ;;  %v2222_v52 = vld [vmem:[%s4472_s4 + $0x38] sm:$0xff] }
 0x6e3   : > { %2157 = vmatmul.mubr.f32.gmra.mxu1 %v1195_v2 }
 0x6e4   : > { %2162 = vmatprep.mubr.f32.mxu1 %v1198_v46 }
 0x6e6   : > { %2248 = vperm.xlu1 %2767, %v2226_v34   ;;  %2263 = vperm.xlu0 %2768, %v2229_v23  }
 0x6e7   : > { %2163 = vmatmul.mubr.f32.gmra.mxu1 %v1197_v56  ;;  %v2920_v22 = vpop.eup %2919 }
 0x6e8   : > { %2168 = vmatprep.mubr.f32.mxu1 %v1200_v32 }
 0x6ea   : > { %2258 = vperm.xlu1 %2767, %v2228_v6  }
 0x6eb   : > { %2169 = vmatmul.mubr.f32.gmra.mxu1 %v1199_v19 }
 0x6ec   : > { %2174 = vmatprep.mubr.f32.mxu1 %v1202_v44  ;;  %v2217_v44 = vld [vmem:[%s4472_s4 + $0x10] sm:$0xff] }
 0x6ee   : > { %2268 = vperm.xlu1 %2767, %v2230_v41  }
 0x6ef   : > { %2175 = vmatmul.mubr.f32.gmra.mxu1 %v1201_v62  ;;  %v2218_v62 = vld [vmem:[%s4472_s4 + $0x18] sm:$0xff] }
 0x6f0   : > { %2359 = vmatprep.mubr.f32.mxu1 %v4561_v50 }
 0x759   : > { %v2234_v34 = vpop.permute.xlu1 %2233  ;;  %v2239_v41 = vpop.permute.xlu0 %2238 }
 0x79b   : > { %v2134_v63 = vpop.f32.mrf.mxu0  ;;  %v2146_v49 = vpop.f32.mrf.mxu1 }
 0x79c   : > { %v2181_v31 = vadd.f32 %v2134_v63, %v4213_v60  ;;  %v2185_v12 = vadd.f32 %v2146_v49, %v4213_v60  ;;  %v2929_v49 = vld [vmem:[%s3101_s9] sm:$0xff] }
 0x79d   : > { %v2136_v21 = vpop.f32.mrf.mxu0  ;;  %v2148_v25 = vpop.f32.mrf.mxu1 }
 0x79e   : > { %v2198_v8 = vmul.f32 %v2918_v11, %v2181_v31  ;;  %v2203_v42 = vmul.f32 %v2918_v11, %v2185_v12  ;;  %v2182_v30 = vadd.f32 %v2136_v21, %v4272_v55  ;;  %v2186_v24 = vadd.f32 %v2148_v25, %v4272_v55  ;;  %v2930_v12 = vld [vmem:[%s3101_s9 + $0x8] sm:$0xff] }
 0x79f   : > { %v2140_v20 = vpop.f32.mrf.mxu0  ;;  %v2152_v3 = vpop.f32.mrf.mxu1 }
 0x7a0   : > { %v2200_v27 = vmul.f32 %v2920_v22, %v2182_v30  ;;  %v2204_v59 = vmul.f32 %v2920_v22, %v2186_v24  ;;  %v2183_v57 = vadd.f32 %v2140_v20, %v4213_v60  ;;  %v2187_v40 = vadd.f32 %v2152_v3, %v4213_v60  ;;  %v2931_v30 = vld [vmem:[%s3101_s9 + $0x10] sm:$0xff]  ;;  %v2932_v3 = vld [vmem:[%s3101_s9 + $0x18] sm:$0xff] }
 0x7a1   : > { %v2142_v10 = vpop.f32.mrf.mxu0  ;;  %v2154_v17 = vpop.f32.mrf.mxu1 }
 0x7a2   : > { %v2201_v15 = vmul.f32 %v2918_v11, %v2183_v57  ;;  %v2205_v26 = vmul.f32 %v2918_v11, %v2187_v40  ;;  %v2184_v13 = vadd.f32 %v2142_v10, %v4272_v55  ;;  %v2188_v38 = vadd.f32 %v2154_v17, %v4272_v55  ;;  %v2933_v40 = vld [vmem:[%s3101_s9 + $0x20] sm:$0xff] }
 0x7a3   : > { %v2158_v61 = vpop.f32.mrf.mxu1 }
 0x7a4   : > { %v2202_v37 = vmul.f32 %v2920_v22, %v2184_v13  ;;  %v2206_v48 = vmul.f32 %v2920_v22, %v2188_v38  ;;  %v2189_v0 = vadd.f32 %v2158_v61, %v4213_v60 }
 0x7a5   : > { %v2160_v33 = vpop.f32.mrf.mxu1 }
 0x7a6   : > { %v2207_v51 = vmul.f32 %v2918_v11, %v2189_v0  ;;  %v2190_v58 = vadd.f32 %v2160_v33, %v4272_v55  ;;  %v2935_v0 = vld [vmem:[%s3101_s9 + $0x30] sm:$0xff] }
 0x7a7   : > { %v2164_v54 = vpop.f32.mrf.mxu1 }
 0x7a8   : > { %v2208_v5 = vmul.f32 %v2920_v22, %v2190_v58  ;;  %v2191_v1 = vadd.f32 %v2164_v54, %v4213_v60  ;;  %v2936_v58 = vld [vmem:[%s3101_s9 + $0x38] sm:$0xff] }
 0x7a9   : > { %v2166_v7 = vpop.f32.mrf.mxu1 }
 0x7aa   : > { %v2209_v36 = vmul.f32 %v2918_v11, %v2191_v1  ;;  %v2192_v47 = vadd.f32 %v2166_v7, %v4272_v55 }
 0x7ab   : > { %v2170_v9 = vpop.f32.mrf.mxu1 }
 0x7ac   : > { %v2210_v14 = vmul.f32 %v2920_v22, %v2192_v47  ;;  %v2193_v16 = vadd.f32 %v2170_v9, %v4213_v60 }
 0x7ad   : > { %v2172_v43 = vpop.f32.mrf.mxu1 }
 0x7ae   : > { %v2211_v53 = vmul.f32 %v2918_v11, %v2193_v16  ;;  %v2194_v2 = vadd.f32 %v2172_v43, %v4272_v55  ;;  %v2938_v43 = vld [vmem:[%s3101_s9 + $0x48] sm:$0xff] }
 0x7af   : > { %v2176_v46 = vpop.f32.mrf.mxu1 }
 0x7b0   : > { %v2212_v18 = vmul.f32 %v2920_v22, %v2194_v2  ;;  %v2195_v56 = vadd.f32 %v2176_v46, %v4213_v60  ;;  %v2215_v60 = vld [vmem:[%s4472_s4] sm:$0xff] }
 0x7b1   : > { %v2178_v28 = vpop.f32.mrf.mxu1 }
 0x7b2   : > { %v2213_v32 = vmul.f32 %v2918_v11, %v2195_v56  ;;  %v2196_v45 = vadd.f32 %v2178_v28, %v4272_v55  ;;  %v2216_v55 = vld [vmem:[%s4472_s4 + $0x8] sm:$0xff] }
 0x7b4   : > { %v2214_v19 = vmul.f32 %v2920_v22, %v2196_v45  ;;  %v2940_v45 = vld [vmem:[%s3101_s9 + $0x58] sm:$0xff] }
 0x7b6   : > { %2311 = vmatprep.subr.mxu1 %v2214_v19 }
 0x7b7   : > { %2312 = vmatpush1.msra.mxu1 %v2213_v32 }
 0x7b8   : > { %2313 = vmatprep.subr.mxu1 %v2212_v18  ;;  %v2939_v18 = vld [vmem:[%s3101_s9 + $0x50] sm:$0xff] }
 0x7b9   : > { %2314 = vmatpush1.msra.mxu1 %v2211_v53 }
 0x7ba   : > { %2315 = vmatprep.subr.mxu1 %v2210_v14 }
 0x7bb   : > { %2316 = vmatpush1.msra.mxu1 %v2209_v36  ;;  %v2937_v36 = vld [vmem:[%s3101_s9 + $0x40] sm:$0xff] }
 0x7bc   : > { %2317 = vmatprep.subr.mxu1 %v2208_v5 }
 0x7bd   : > { %2318 = vmatpush1.msra.mxu1 %v2207_v51 }
 0x7be   : > { %2319 = vmatprep.subr.mxu1 %v2206_v48 }
 0x7bf   : > { %2320 = vmatpush1.msra.mxu1 %v2205_v26  ;;  %v2934_v26 = vld [vmem:[%s3101_s9 + $0x28] sm:$0xff] }
 0x7c0   : > { %2321 = vmatprep.subr.mxu1 %v2204_v59 }
 0x7c1   : > { %2322 = vmatpush1.msra.mxu1 %v2203_v42 }
 0x7c2   : > { %2323 = vmatprep.subr.mxu1 %v2202_v37  ;;  %v2254_v37 = vpop.permute.xlu0 %2253 }
 0x7c3   : > { %2324 = vmatpush1.msra.mxu1 %v2201_v15 }
 0x7c4   : > { %2325 = vmatprep.subr.mxu1 %v2200_v27 }
 0x7c5   : > { %2326 = vmatpush1.msra.mxu1 %v2198_v8  ;;  %v2244_v8 = vpop.permute.xlu1 %2243 }
 0x7c6   : > { %2587 = vmatmul.mubr.msk.f32.vlgmr.msra.gmra.mxu1 %vm320_vm0, %v2215_v60  ;;  %v2264_v32 = vpop.permute.xlu0 %2263 }
 0x7c7   : > { %2365 = vmatprep.mubr.f32.mxu1 %v4561_v50 }
 0x7c9   : > { %v2249_v15 = vpop.permute.xlu1 %2248 }
 0x7ca   : > { %2588 = vmatmul.mubr.msk.f32.gmra.mxu1 %vm320_vm0, %v2216_v55 }
 0x7cb   : > { %2371 = vmatprep.mubr.f32.mxu1 %v4561_v50 }
 0x7cd   : > { %v2259_v14 = vpop.permute.xlu1 %2258 }
 0x7ce   : > { %2589 = vmatmul.mubr.msk.f32.gmra.mxu1 %vm320_vm0, %v2217_v44 }
 0x7cf   : > { %2377 = vmatprep.mubr.f32.mxu1 %v4561_v50 }
 0x7d2   : > { %2590 = vmatmul.mubr.msk.f32.gmra.mxu1 %vm320_vm0, %v2218_v62  ;;  %v2941_v62 = vld [vmem:[%s3101_s9 + $0x60] sm:$0xff] }
 0x7d3   : > { %2383 = vmatprep.mubr.f32.mxu1 %v4561_v50 }
 0x7d6   : > { %2591 = vmatmul.mubr.msk.f32.gmra.mxu1 %vm320_vm0, %v2219_v4 }
 0x7d7   : > { %2389 = vmatprep.mubr.f32.mxu1 %v4561_v50 }
 0x7da   : > { %2592 = vmatmul.mubr.msk.f32.gmra.mxu1 %vm320_vm0, %v2220_v39 }
 0x7db   : > { %2395 = vmatprep.mubr.f32.mxu1 %v4561_v50 }
 0x7de   : > { %2593 = vmatmul.mubr.msk.f32.gmra.mxu1 %vm320_vm0, %v2221_v29  ;;  %v2269_v29 = vpop.permute.xlu1 %2268 }
 0x7df   : > { %2401 = vmatprep.mubr.f32.mxu1 %v4561_v50 }
 0x7e2   : > { %2594 = vmatmul.mubr.msk.f32.gmra.mxu1 %vm320_vm0, %v2222_v52 }
 0x886   : > { %v2361_v35 = vpop.f32.mrf.mxu1 }
 0x887   : > { %v2362_v23 = vadd.f32 %v2361_v35, %v2234_v34  ;;  %v2942_v35 = vld [vmem:[%s3101_s9 + $0x68] sm:$0xff] }
 0x888   : > { %v2363_v6 = vpop.f32.mrf.mxu1 }
 0x889   : > { %v2364_v63 = vadd.f32 %v2363_v6, %v2234_v34  ;;  %v2408_v31 = vadd.f32 %v2929_v49, %v2362_v23  ;;  %v2944_v49 = vld [vmem:[%s3101_s9 + $0x78] sm:$0xff] }
 0x88a   : > { %v2367_v50 = vpop.f32.mrf.mxu1 }
 0x88b   : > { %v2409_v11 = vadd.f32 %v2930_v12, %v2364_v63  ;;  %2424 = vst [vmem:[%s4385_s6] sm:$0xff] %v2408_v31  ;;  %v2368_v21 = vadd.f32 %v2367_v50, %v2239_v41 }
 0x88c   : > { %v2369_v25 = vpop.f32.mrf.mxu1 }
 0x88d   : > { %2425 = vst [vmem:[%s4385_s6 + $0x8] sm:$0xff] %v2409_v11  ;;  %v2370_v42 = vadd.f32 %v2369_v25, %v2239_v41  ;;  %v2410_v24 = vadd.f32 %v2931_v30, %v2368_v21  ;;  %v2943_v41 = vld [vmem:[%s3101_s9 + $0x70] sm:$0xff] }
 0x88e   : > { %v2373_v22 = vpop.f32.mrf.mxu1 }
 0x88f   : > { %v2374_v20 = vadd.f32 %v2373_v22, %v2244_v8  ;;  %v2411_v27 = vadd.f32 %v2932_v3, %v2370_v42  ;;  %2426 = vst [vmem:[%s4385_s6 + $0x10] sm:$0xff] %v2410_v24 }
 0x890   : > { %v2375_v59 = vpop.f32.mrf.mxu1 }
 0x891   : > { %v2376_v57 = vadd.f32 %v2375_v59, %v2244_v8  ;;  %v2412_v10 = vadd.f32 %v2933_v40, %v2374_v20  ;;  %2427 = vst [vmem:[%s4385_s6 + $0x18] sm:$0xff] %v2411_v27 }
 0x892   : > { %v2379_v17 = vpop.f32.mrf.mxu1 }
 0x893   : > { %v2413_v13 = vadd.f32 %v2934_v26, %v2376_v57  ;;  %2428 = vst [vmem:[%s4385_s6 + $0x20] sm:$0xff] %v2412_v10  ;;  %v2380_v38 = vadd.f32 %v2379_v17, %v2249_v15 }
 0x894   : > { %v2381_v61 = vpop.f32.mrf.mxu1 }
 0x895   : > { %2429 = vst [vmem:[%s4385_s6 + $0x28] sm:$0xff] %v2413_v13  ;;  %v2382_v48 = vadd.f32 %v2381_v61, %v2249_v15  ;;  %v2414_v33 = vadd.f32 %v2935_v0, %v2380_v38 }
 0x896   : > { %v2385_v51 = vpop.f32.mrf.mxu1 }
 0x897   : > { %v2415_v54 = vadd.f32 %v2936_v58, %v2382_v48  ;;  %2430 = vst [vmem:[%s4385_s6 + $0x30] sm:$0xff] %v2414_v33  ;;  %v2386_v5 = vadd.f32 %v2385_v51, %v2254_v37 }
 0x898   : > { %v2387_v1 = vpop.f32.mrf.mxu1 }
 0x899   : > { %2431 = vst [vmem:[%s4385_s6 + $0x38] sm:$0xff] %v2415_v54  ;;  %v2388_v7 = vadd.f32 %v2387_v1, %v2254_v37  ;;  %v2416_v47 = vadd.f32 %v2937_v36, %v2386_v5 }
 0x89a   : > { %v2391_v9 = vpop.f32.mrf.mxu1 }
 0x89b   : > { %v2392_v16 = vadd.f32 %v2391_v9, %v2259_v14  ;;  %v2417_v53 = vadd.f32 %v2938_v43, %v2388_v7  ;;  %2432 = vst [vmem:[%s4385_s6 + $0x40] sm:$0xff] %v2416_v47 }
 0x89c   : > { %v2393_v2 = vpop.f32.mrf.mxu1 }
 0x89d   : > { %v2394_v46 = vadd.f32 %v2393_v2, %v2259_v14  ;;  %v2418_v56 = vadd.f32 %v2939_v18, %v2392_v16  ;;  %2433 = vst [vmem:[%s4385_s6 + $0x48] sm:$0xff] %v2417_v53 }
 0x89e   : > { %v2397_v28 = vpop.f32.mrf.mxu1 }
 0x89f   : > { %v2419_v19 = vadd.f32 %v2940_v45, %v2394_v46  ;;  %2434 = vst [vmem:[%s4385_s6 + $0x50] sm:$0xff] %v2418_v56  ;;  %v2398_v60 = vadd.f32 %v2397_v28, %v2264_v32 }
 0x8a0   : > { %v2399_v55 = vpop.f32.mrf.mxu1 }
 0x8a1   : > { %2435 = vst [vmem:[%s4385_s6 + $0x58] sm:$0xff] %v2419_v19  ;;  %v2400_v44 = vadd.f32 %v2399_v55, %v2264_v32  ;;  %v2420_v4 = vadd.f32 %v2941_v62, %v2398_v60 }
 0x8a2   : > { %v2403_v39 = vpop.f32.mrf.mxu1 }
 0x8a3   : > { %v2404_v52 = vadd.f32 %v2403_v39, %v2269_v29  ;;  %v2421_v34 = vadd.f32 %v2942_v35, %v2400_v44  ;;  %2436 = vst [vmem:[%s4385_s6 + $0x60] sm:$0xff] %v2420_v4 }
 0x8a4   : > { %v2405_v23 = vpop.f32.mrf.mxu1 }
 0x8a5   : > { %v2406_v6 = vadd.f32 %v2405_v23, %v2269_v29  ;;  %v2422_v63 = vadd.f32 %v2943_v41, %v2404_v52  ;;  %2437 = vst [vmem:[%s4385_s6 + $0x68] sm:$0xff] %v2421_v34 }
 0x8a7   : > { %v2423_v31 = vadd.f32 %v2944_v49, %v2406_v6  ;;  %2438 = vst [vmem:[%s4385_s6 + $0x70] sm:$0xff] %v2422_v63 }
 0x8a9   : > { %2439 = vst [vmem:[%s4385_s6 + $0x78] sm:$0xff] %v2423_v31 }
 0x8aa   : > { %2958 = shalt.err (!%p2955_p3)
}
 0x8ab   : > { %s2959_s9 = scalar_lea.hbm %s4419_s13, 2048  ;;  %s2963_s25 = scalar_lea.hbm %s4473_s5, 4096 }
 0x8ac   : > { %p2960_p4 = scmp.ne.s32.totalorder %s4419_s13, %s2959_s9  ;;  %p2964_p9 = scmp.lt.s32.totalorder %s4419_s13, %s4473_s5 }
 0x8ad   : > { %p2965_p10 = scmp.lt.s32.totalorder %s2963_s25, %s2959_s9 }
 0x8ae   : > { %p2961_p7 = pnand %p2960_p4, %p3086_p5 }
 0x8af   : > { %p2966_p11 = por %p2965_p10, %p2964_p9 }
 0x8b0   : > { %p2962_p8 = pneg %p2961_p7 }
 0x8b2   : > { %p2967_p12 = pnand %p2966_p11, %p2962_p8 }
 0x8b4   : > { %2970 = shalt.err (!%p2967_p12)
}
 0x8b5   : > { %s3016_s6 = smov 256   ;;  %s3017_s7 = smov 16  }
 0x8b6   : > { %2710 = dma.vmem_to_hbm [thread:$0]  (%p3086_p5), %s4421_s8, 2048, %s4419_s13, %s4428_s22, %s3016_s6, %s3016_s6, %s3017_s7  }
 0x8b7 PF: > { %p2716_p13 = scmp.ge.s32.totalorder %s3005_s21, 2  ;;  %s2469_s10 = sand.u32 1, %s2993_s18  }
 0x8b8   : > { %s2470_s12 = scalar_lea.sflag [#allocation5], %s2469_s10 }
 0x8b9   : > { %p2713_p0 = pnand %p2716_p13, %p3090_p6 }
 0x8bb   : > { %p2714_p1 = pneg %p2713_p0 }
 0x8bd   : > { %2988 = dma.done.wait (%p2714_p1), %s2470_s12, 2048  }
 0x8be   : > { %2990 = vsyncadd (%p2714_p1), %s2470_s12, 4294965248  ;;  %p15_p2 = scmp.ge.s32.totalorder %s3073_s24, 4   ;;  %s4562_s18 = smov %s2997_s19 }
 0x8bf   : > { %s4563_s19 = smov %s3001_s20  ;;  %s4564_s20 = smov %s3084_s27 }
 0x8c0   : > { %s4565_s21 = smov %s3073_s24  ;;  %17 = sbr.rel (!%p15_p2) target bundleno = 3 (0x3), region = 75 }
 0x8c5   :  { %2475 = vsyncpa [#allocation5], 1 }
 0x8c6   :  { %2477 = vsyncpa [#allocation5 + $0x1], 1 }

</bundles_post_ra>
